<compile_context>
chip_gen: v6e
topology: v6e:2x2x1
jax: 0.10.0
libtpu: 0.0.40
codegen_flags: <defaults>
</compile_context>

<pallas_src>
import math

import numpy as np
import jax
import jax.numpy as jnp
from jax import lax
from jax.experimental import pallas as pl
from jax.experimental.pallas import tpu as pltpu


# ----------------------------------------------------------------------------
# In-kernel helpers
# ----------------------------------------------------------------------------
def _layer_norm(x, g, b, eps=1e-5):
    mu = jnp.mean(x, axis=-1, keepdims=True)
    var = jnp.mean((x - mu) ** 2, axis=-1, keepdims=True)
    return (x - mu) * lax.rsqrt(var + eps) * g + b


def _make_decoder_kernel(nhead, head_dim):
    H, hd = nhead, head_dim
    scale = 1.0 / math.sqrt(head_dim)
    bf16 = jnp.bfloat16

    def kernel(x_ref, pad_ref,
               wqkv_ref, bqkv_ref, wo_ref, bo_ref, xb_ref,
               ln1g_ref, ln1b_ref, ln2g_ref, ln2b_ref,
               w1_ref, b1_ref, w2_ref, b2_ref,
               ln3g_ref, ln3b_ref,
               dec_ref,
               bias_scr):
        l = pl.program_id(0)          # layer (outer, weights fetched once/layer)
        b = pl.program_id(1)          # batch element (inner)
        _, S, D = x_ref.shape

        # First layer for this batch element: build the causal+pad additive
        # bias once (it does not depend on l) and load the embedded input into
        # the VMEM-resident output block, which doubles as the running
        # activation across all layers.
        @pl.when(l == 0)
        def _():
            rows = lax.broadcasted_iota(jnp.int32, (S, S), 0)
            cols = lax.broadcasted_iota(jnp.int32, (S, S), 1)
            pad_row = jnp.broadcast_to(pad_ref[b], (S, S))      # (S, S)
            bias_scr[b] = jnp.where(cols > rows, jnp.float32(-1e30), pad_row)
            dec_ref[b] = x_ref[b]

        x = dec_ref[b]                    # (S, D) float32, layer input
        bias = bias_scr[b]                # (S, S) additive attention bias

        # --- self attention -------------------------------------------------
        x_b = x.astype(bf16)
        # One lane-dense fused QKV matmul: (S, D) @ (D, 3D).
        qkv = jnp.dot(x_b, wqkv_ref[...],
                      preferred_element_type=jnp.float32) + bqkv_ref[...]

        def heads(m):                     # (S, D) -> (H, S, hd), head-major
            return jnp.transpose(m.reshape(S, H, hd), (1, 0, 2))

        qh = heads(qkv[:, :D]).astype(bf16)
        kh = heads(qkv[:, D:2 * D]).astype(bf16)
        vh = heads(qkv[:, 2 * D:]).astype(bf16)

        sc = jnp.einsum('hqe,hke->hqk', qh, kh,
                        preferred_element_type=jnp.float32) * scale
        sc = sc + bias[None, :, :]
        sc_max = jnp.max(sc, axis=-1, keepdims=True)
        e = jnp.exp(sc - sc_max)
        p = e * pl.reciprocal(jnp.sum(e, axis=-1, keepdims=True), approx=True)

        oh = jnp.einsum('hqk,hke->hqe', p.astype(bf16), vh,
                        preferred_element_type=jnp.float32)      # (H, S, hd)
        # concat-of-heads @ Wo as one lane-dense (S, D) @ (D, D) matmul.
        o_cat = jnp.transpose(oh, (1, 0, 2)).reshape(S, D)
        attn = jnp.dot(o_cat.astype(bf16), wo_ref[...],
                       preferred_element_type=jnp.float32) + bo_ref[...]

        x1 = _layer_norm(x + attn, ln1g_ref[...], ln1b_ref[...])

        # --- cross attention against the zero-length memory tensor ----------
        # softmax over an empty key set contributes nothing; the block output
        # is exactly the MHA out-projection bias broadcast over all positions.
        x2 = _layer_norm(x1 + xb_ref[...], ln2g_ref[...], ln2b_ref[...])

        # --- feed-forward (relu) ---------------------------------------------
        h1 = jnp.maximum(
            jnp.dot(x2.astype(bf16), w1_ref[...],
                    preferred_element_type=jnp.float32) + b1_ref[...], 0.0)
        ff = jnp.dot(h1.astype(bf16), w2_ref[...],
                     preferred_element_type=jnp.float32) + b2_ref[...]
        x3 = _layer_norm(x2 + ff, ln3g_ref[...], ln3b_ref[...])

        dec_ref[b] = x3                   # stays resident in VMEM across layers

    return kernel


def _outproj_kernel(x_ref, w_ref, b_ref, o_ref):
    o_ref[...] = (jnp.dot(x_ref[...].astype(jnp.bfloat16), w_ref[...],
                          preferred_element_type=jnp.float32) + b_ref[...])


# ----------------------------------------------------------------------------
# Wrapper helpers
# ----------------------------------------------------------------------------
def _pick_vmem_limit():
    cap = 64 * 1024 * 1024            # conservative fallback (v7x per-TC VMEM)
    try:
        cap = int(pltpu.get_tpu_info().vmem_capacity_bytes)
    except Exception:
        pass
    # ~80% of physical capacity, capped near the useful v5e/v6e ceiling.
    return min(int(cap * 0.8), 110 * 1024 * 1024)


def _pick_vocab_tile(V):
    for cand in (4096, 2048, 1024, 512, 256, 128):
        if V % cand == 0:
            return cand
    return V


# ----------------------------------------------------------------------------
# Forward pass: embeddings (XLA) -> fused decoder stack -> vocab projection
# ----------------------------------------------------------------------------
def forward(params, input_ids, attention_mask):
    """input_ids: (B, S) int; attention_mask: (B, S) 1=real / 0=pad.
    Returns logits (B, S, vocab_size) float32."""
    B, S = input_ids.shape
    emb = params["emb"]
    D = emb.shape[1]
    H = params["nhead"]
    hd = D // H
    L = params["num_layers"]
    lp = params["layers"]                   # dict of stacked (L, ...) arrays
    F = lp["w1"].shape[-1]
    V = params["out_w"].shape[1]
    bf16 = jnp.bfloat16

    # Glue (plain XLA): embedding gather + sinusoidal PE (dropout = identity).
    x = (jnp.take(emb, input_ids, axis=0)
         + params["pe"][None, :S, :]).astype(jnp.float32)

    # Padding part of the mask only (causal is built in-kernel). Reproduces the
    # torch forward: tgt_mask uses combined_mask[0] (batch-0 padding) and
    # tgt_key_padding_mask uses each batch's own padding.
    pad0 = attention_mask[0] == 0
    pad_any = pad0[None, :] | (attention_mask == 0)                      # (B, S)
    pad_bias = jnp.where(pad_any, -1e30, 0.0).astype(jnp.float32)[:, None, :]

    # Pack weights: fused (D, 3D) QKV, bf16 matmul operands (biases stay f32).
    wqkv = jnp.concatenate([lp["wq"], lp["wk"], lp["wv"]], axis=-1).astype(bf16)
    bqkv = jnp.concatenate([lp["bq"], lp["bk"], lp["bv"]], axis=-1)      # (L,1,3D)
    wo = lp["wo"].astype(bf16)                                           # (L,D,D)
    w1 = lp["w1"].astype(bf16)
    w2 = lp["w2"].astype(bf16)
    out_w = params["out_w"].astype(bf16)

    vmem_limit = _pick_vmem_limit()

    def resident(shape):        # full array, constant block index -> DMA'd once
        nd = len(shape)
        return pl.BlockSpec(shape, lambda l, b, _nd=nd: (0,) * _nd)

    def layered(shape):         # indexed by layer only -> fetched once per layer
        nd = len(shape)
        return pl.BlockSpec((None,) + shape, lambda l, b, _nd=nd: (l,) + (0,) * _nd)

    in_specs = [
        resident((B, S, D)),                 # embedded input
        resident((B, 1, S)),                 # padding additive bias row
        layered((D, 3 * D)),                 # fused Wqkv
        layered((1, 3 * D)),                 # fused bqkv
        layered((D, D)),                     # Wo
        layered((1, D)),                     # bo
        layered((1, D)),                     # cross-attn out-proj bias
        layered((1, D)), layered((1, D)),    # LN1 gamma, beta
        layered((1, D)), layered((1, D)),    # LN2 gamma, beta
        layered((D, F)), layered((1, F)),    # W1, b1
        layered((F, D)), layered((1, D)),    # W2, b2
        layered((1, D)), layered((1, D)),    # LN3 gamma, beta
    ]

    dec = pl.pallas_call(
        _make_decoder_kernel(H, hd),
        out_shape=jax.ShapeDtypeStruct((B, S, D), jnp.float32),
        grid=(L, B),                         # L outermost: weights deduped over B
        in_specs=in_specs,
        out_specs=resident((B, S, D)),       # resident running activation
        scratch_shapes=[pltpu.VMEM((B, S, S), jnp.float32)],   # causal+pad bias
        compiler_params=pltpu.CompilerParams(
            dimension_semantics=("arbitrary", "arbitrary"),
            vmem_limit_bytes=vmem_limit),
    )(x, pad_bias,
      wqkv, bqkv, wo, lp["bo"], lp["xattn_b"],
      lp["ln1g"], lp["ln1b"], lp["ln2g"], lp["ln2b"],
      w1, lp["b1"], w2, lp["b2"],
      lp["ln3g"], lp["ln3b"])

    # Vocab-tiled output projection as a separate pallas_call (keeps the (D, V)
    # weight out of VMEM during the layer loop).
    vt = _pick_vocab_tile(V)
    logits = pl.pallas_call(
        _outproj_kernel,
        out_shape=jax.ShapeDtypeStruct((B, S, V), jnp.float32),
        grid=(B, V // vt),
        in_specs=[pl.BlockSpec((None, S, D), lambda b, j: (b, 0, 0)),
                  pl.BlockSpec((D, vt), lambda b, j: (0, j)),
                  pl.BlockSpec((1, vt), lambda b, j: (0, j))],
        out_specs=pl.BlockSpec((None, S, vt), lambda b, j: (b, 0, j)),
        compiler_params=pltpu.CompilerParams(
            dimension_semantics=("parallel", "parallel"),
            vmem_limit_bytes=vmem_limit),
    )(dec, out_w, params["out_b"])
    return logits


# ----------------------------------------------------------------------------
# Deterministic parameter init (synthetic; shapes follow the nn.Module __init__)
# ----------------------------------------------------------------------------
def init_params(key, vocab_size, d_model, nhead, num_layers, dim_feedforward,
                max_len=512):
    def nrm(k, shape, scale=0.02):
        return scale * jax.random.normal(k, shape, dtype=jnp.float32)

    keys = iter(jax.random.split(key, 3 + 13 * num_layers))
    params = {"nhead": nhead, "num_layers": num_layers}
    params["emb"] = nrm(next(keys), (vocab_size, d_model))

    # sinusoidal positional encoding buffer
    position = jnp.arange(max_len, dtype=jnp.float32)[:, None]
    div_term = jnp.exp(jnp.arange(0, d_model, 2, dtype=jnp.float32)
                       * (-np.log(10000.0) / d_model))
    pe = jnp.zeros((max_len, d_model), dtype=jnp.float32)
    pe = pe.at[:, 0::2].set(jnp.sin(position * div_term))
    pe = pe.at[:, 1::2].set(jnp.cos(position * div_term))
    params["pe"] = pe

    per_layer = []
    for _ in range(num_layers):
        lp = {
            "wq": nrm(next(keys), (d_model, d_model)),
            "bq": nrm(next(keys), (1, d_model)),
            "wk": nrm(next(keys), (d_model, d_model)),
            "bk": nrm(next(keys), (1, d_model)),
            "wv": nrm(next(keys), (d_model, d_model)),
            "bv": nrm(next(keys), (1, d_model)),
            "wo": nrm(next(keys), (d_model, d_model)),
            "bo": nrm(next(keys), (1, d_model)),
            # cross-attention (empty memory) contributes only its out-proj bias
            "xattn_b": nrm(next(keys), (1, d_model)),
            "ln1g": jnp.ones((1, d_model), jnp.float32),
            "ln1b": jnp.zeros((1, d_model), jnp.float32),
            "ln2g": jnp.ones((1, d_model), jnp.float32),
            "ln2b": jnp.zeros((1, d_model), jnp.float32),
            "w1": nrm(next(keys), (d_model, dim_feedforward)),
            "b1": nrm(next(keys), (1, dim_feedforward)),
            "w2": nrm(next(keys), (dim_feedforward, d_model)),
            "b2": nrm(next(keys), (1, d_model)),
            "ln3g": jnp.ones((1, d_model), jnp.float32),
            "ln3b": jnp.zeros((1, d_model), jnp.float32),
        }
        per_layer.append(lp)

    # Stack per-layer tensors into (L, ...) arrays so ONE pallas_call with a
    # layer grid axis covers the whole decoder stack.
    params["layers"] = {k: jnp.stack([lp[k] for lp in per_layer], axis=0)
                        for k in per_layer[0]}

    params["out_w"] = nrm(next(keys), (d_model, vocab_size))
    params["out_b"] = nrm(next(keys), (1, vocab_size))
    return params


# ----------------------------------------------------------------------------
if __name__ == "__main__":
    vocab_size = 64
    d_model = 32
    nhead = 4
    num_layers = 2
    dim_feedforward = 64
    B, S = 2, 8

    key = jax.random.PRNGKey(0)
    k_ids, k_params = jax.random.split(key)

    input_ids = jax.random.randint(k_ids, (B, S), 0, vocab_size, dtype=jnp.int32)
    # batch 0 fully real, batch 1 has two trailing pad tokens
    attention_mask = jnp.array(
        [[1, 1, 1, 1, 1, 1, 1, 1],
         [1, 1, 1, 1, 1, 1, 0, 0]], dtype=jnp.int32)

    params = init_params(k_params, vocab_size, d_model, nhead,
                         num_layers, dim_feedforward)

    logits = forward(params, input_ids, attention_mask)
    logits = jax.block_until_ready(logits)

    assert logits.shape == (B, S, vocab_size), logits.shape
    assert bool(jnp.all(jnp.isfinite(logits)))
    print("KERNEL_OK")
</pallas_src>

<mosaic_0001>
module attributes {stable_mosaic.version = 11 : i64} {
  func.func @kernel(%arg0: i32, %arg1: i32, %arg2: memref<2x8x32xf32, #tpu.memory_space<vmem>>, %arg3: memref<2x1x8xf32, #tpu.memory_space<vmem>>, %arg4: memref<1x32x96xbf16, #tpu.memory_space<vmem>>, %arg5: memref<1x1x96xf32, #tpu.memory_space<vmem>>, %arg6: memref<1x32x32xbf16, #tpu.memory_space<vmem>>, %arg7: memref<1x1x32xf32, #tpu.memory_space<vmem>>, %arg8: memref<1x1x32xf32, #tpu.memory_space<vmem>>, %arg9: memref<1x1x32xf32, #tpu.memory_space<vmem>>, %arg10: memref<1x1x32xf32, #tpu.memory_space<vmem>>, %arg11: memref<1x1x32xf32, #tpu.memory_space<vmem>>, %arg12: memref<1x1x32xf32, #tpu.memory_space<vmem>>, %arg13: memref<1x32x64xbf16, #tpu.memory_space<vmem>>, %arg14: memref<1x1x64xf32, #tpu.memory_space<vmem>>, %arg15: memref<1x64x32xbf16, #tpu.memory_space<vmem>>, %arg16: memref<1x1x32xf32, #tpu.memory_space<vmem>>, %arg17: memref<1x1x32xf32, #tpu.memory_space<vmem>>, %arg18: memref<1x1x32xf32, #tpu.memory_space<vmem>>, %arg19: memref<2x8x32xf32, #tpu.memory_space<vmem>>, %arg20: memref<2x8x8xf32, #tpu.memory_space<vmem>>) attributes {dimension_semantics = [#tpu.dimension_semantics<arbitrary>, #tpu.dimension_semantics<arbitrary>], iteration_bounds = array<i64: 2, 2>, scalar_prefetch = 0 : i64, scratch_operands = 1 : i64, tpu.core_type = #tpu.core_type<tc>, window_params = [{pipeline_mode = #tpu.pipeline_mode<synchronous>, transform_indices = @transform_0, window_bounds = array<i64: 2, 8, 32>}, {pipeline_mode = #tpu.pipeline_mode<synchronous>, transform_indices = @transform_1, window_bounds = array<i64: 2, 1, 8>}, {transform_indices = @transform_2, window_bounds = array<i64: 1, 32, 96>}, {transform_indices = @transform_3, window_bounds = array<i64: 1, 1, 96>}, {transform_indices = @transform_4, window_bounds = array<i64: 1, 32, 32>}, {transform_indices = @transform_5, window_bounds = array<i64: 1, 1, 32>}, {transform_indices = @transform_6, window_bounds = array<i64: 1, 1, 32>}, {transform_indices = @transform_7, window_bounds = array<i64: 1, 1, 32>}, {transform_indices = @transform_8, window_bounds = array<i64: 1, 1, 32>}, {transform_indices = @transform_9, window_bounds = array<i64: 1, 1, 32>}, {transform_indices = @transform_10, window_bounds = array<i64: 1, 1, 32>}, {transform_indices = @transform_11, window_bounds = array<i64: 1, 32, 64>}, {transform_indices = @transform_12, window_bounds = array<i64: 1, 1, 64>}, {transform_indices = @transform_13, window_bounds = array<i64: 1, 64, 32>}, {transform_indices = @transform_14, window_bounds = array<i64: 1, 1, 32>}, {transform_indices = @transform_15, window_bounds = array<i64: 1, 1, 32>}, {transform_indices = @transform_16, window_bounds = array<i64: 1, 1, 32>}, {pipeline_mode = #tpu.pipeline_mode<synchronous>, transform_indices = @transform_17, window_bounds = array<i64: 2, 8, 32>}]} {
    %c0_i32 = arith.constant 0 : i32
    %0 = arith.cmpi eq, %arg0, %c0_i32 : i32
    %1 = arith.extui %0 : i1 to i32
    %c0_i32_0 = arith.constant 0 : i32
    %2 = arith.cmpi ne, %1, %c0_i32_0 : i32
    scf.if %2 {
      %163 = tpu.iota {dimensions = array<i32: 0>} : vector<8x8xi32>
      %164 = tpu.iota {dimensions = array<i32: 1>} : vector<8x8xi32>
      %165 = arith.index_cast %arg1 : i32 to index
      %c0_75 = arith.constant 0 : index
      %c0_76 = arith.constant 0 : index
      %166 = vector.load %arg3[%165, %c0_75, %c0_76] : memref<2x1x8xf32, #tpu.memory_space<vmem>>, vector<1x1x8xf32>
      %167 = vector.shape_cast %166 : vector<1x1x8xf32> to vector<1x8xf32>
      %168 = vector.shape_cast %167 : vector<1x8xf32> to vector<1x8xf32>
      %169 = vector.broadcast %168 : vector<1x8xf32> to vector<8x8xf32>
      %170 = arith.cmpi sgt, %164, %163 : vector<8x8xi32>
      %cst_77 = arith.constant -1.000000e+30 : f32
      %171 = vector.broadcast %cst_77 : f32 to vector<8x8xf32>
      %172 = arith.select %170, %171, %169 : vector<8x8xi1>, vector<8x8xf32>
      %173 = arith.index_cast %arg1 : i32 to index
      %c0_78 = arith.constant 0 : index
      %c0_79 = arith.constant 0 : index
      %174 = vector.load %arg20[%173, %c0_78, %c0_79] : memref<2x8x8xf32, #tpu.memory_space<vmem>>, vector<1x8x8xf32>
      %175 = vector.shape_cast %174 : vector<1x8x8xf32> to vector<8x8xf32>
      %176 = vector.shape_cast %172 : vector<8x8xf32> to vector<1x8x8xf32>
      tpu.vector_store %arg20[%173, %c0_78, %c0_79], %176 {strides = array<i32>} : memref<2x8x8xf32, #tpu.memory_space<vmem>>, vector<1x8x8xf32>,
      %177 = arith.index_cast %arg1 : i32 to index
      %c0_80 = arith.constant 0 : index
      %c0_81 = arith.constant 0 : index
      %178 = vector.load %arg2[%177, %c0_80, %c0_81] : memref<2x8x32xf32, #tpu.memory_space<vmem>>, vector<1x8x32xf32>
      %179 = vector.shape_cast %178 : vector<1x8x32xf32> to vector<8x32xf32>
      %180 = arith.index_cast %arg1 : i32 to index
      %c0_82 = arith.constant 0 : index
      %c0_83 = arith.constant 0 : index
      %181 = vector.load %arg19[%180, %c0_82, %c0_83] : memref<2x8x32xf32, #tpu.memory_space<vmem>>, vector<1x8x32xf32>
      %182 = vector.shape_cast %181 : vector<1x8x32xf32> to vector<8x32xf32>
      %183 = vector.shape_cast %179 : vector<8x32xf32> to vector<1x8x32xf32>
      tpu.vector_store %arg19[%180, %c0_82, %c0_83], %183 {strides = array<i32>} : memref<2x8x32xf32, #tpu.memory_space<vmem>>, vector<1x8x32xf32>,
    } else {
    }
    %3 = arith.index_cast %arg1 : i32 to index
    %c0 = arith.constant 0 : index
    %c0_1 = arith.constant 0 : index
    %4 = vector.load %arg19[%3, %c0, %c0_1] : memref<2x8x32xf32, #tpu.memory_space<vmem>>, vector<1x8x32xf32>
    %5 = vector.shape_cast %4 : vector<1x8x32xf32> to vector<8x32xf32>
    %6 = arith.index_cast %arg1 : i32 to index
    %c0_2 = arith.constant 0 : index
    %c0_3 = arith.constant 0 : index
    %7 = vector.load %arg20[%6, %c0_2, %c0_3] : memref<2x8x8xf32, #tpu.memory_space<vmem>>, vector<1x8x8xf32>
    %8 = vector.shape_cast %7 : vector<1x8x8xf32> to vector<8x8xf32>
    %9 = arith.truncf %5 : vector<8x32xf32> to vector<8x32xbf16>
    %c0_4 = arith.constant 0 : index
    %c0_5 = arith.constant 0 : index
    %c0_6 = arith.constant 0 : index
    %10 = vector.load %arg4[%c0_4, %c0_5, %c0_6] : memref<1x32x96xbf16, #tpu.memory_space<vmem>>, vector<1x32x96xbf16>
    %11 = vector.shape_cast %10 : vector<1x32x96xbf16> to vector<32x96xbf16>
    %cst = arith.constant dense<0.000000e+00> : vector<8x96xf32>
    %12 = tpu.matmul %9, %11, %cst {dimension_numbers = #tpu.dot_dimension_numbers<[1], [0], [0], [1], [0, 0, 1, 1], [], []>} : vector<8x32xbf16>, vector<32x96xbf16>, vector<8x96xf32> -> vector<8x96xf32>
    %c0_7 = arith.constant 0 : index
    %c0_8 = arith.constant 0 : index
    %c0_9 = arith.constant 0 : index
    %13 = vector.load %arg5[%c0_7, %c0_8, %c0_9] : memref<1x1x96xf32, #tpu.memory_space<vmem>>, vector<1x1x96xf32>
    %14 = vector.shape_cast %13 : vector<1x1x96xf32> to vector<1x96xf32>
    %15 = vector.broadcast %14 : vector<1x96xf32> to vector<8x96xf32>
    %16 = arith.addf %12, %15 : vector<8x96xf32>
    %17 = vector.extract_strided_slice %16 {offsets = [0, 0], sizes = [8, 32], strides = [1, 1]} : vector<8x96xf32> to vector<8x32xf32>
    %18 = vector.shape_cast %17 : vector<8x32xf32> to vector<8x4x8xf32>
    %19 = tpu.transpose %18, [1, 0, 2] : vector<8x4x8xf32> -> vector<4x8x8xf32>
    %20 = arith.truncf %19 : vector<4x8x8xf32> to vector<4x8x8xbf16>
    %21 = vector.extract_strided_slice %16 {offsets = [0, 32], sizes = [8, 32], strides = [1, 1]} : vector<8x96xf32> to vector<8x32xf32>
    %22 = vector.shape_cast %21 : vector<8x32xf32> to vector<8x4x8xf32>
    %23 = tpu.transpose %22, [1, 0, 2] : vector<8x4x8xf32> -> vector<4x8x8xf32>
    %24 = arith.truncf %23 : vector<4x8x8xf32> to vector<4x8x8xbf16>
    %25 = vector.extract_strided_slice %16 {offsets = [0, 64], sizes = [8, 32], strides = [1, 1]} : vector<8x96xf32> to vector<8x32xf32>
    %26 = vector.shape_cast %25 : vector<8x32xf32> to vector<8x4x8xf32>
    %27 = tpu.transpose %26, [1, 0, 2] : vector<8x4x8xf32> -> vector<4x8x8xf32>
    %28 = arith.truncf %27 : vector<4x8x8xf32> to vector<4x8x8xbf16>
    "tpu.trace_start"() <{level = 10 : i32, message = "hqe,hke->hqk"}> : () -> ()
    %cst_10 = arith.constant dense<0.000000e+00> : vector<4x8x8xf32>
    %29 = tpu.matmul %20, %24, %cst_10 {dimension_numbers = #tpu.dot_dimension_numbers<[2], [2], [1], [1], [0, 0, 0, 1, 1, 1], [0], [0]>} : vector<4x8x8xbf16>, vector<4x8x8xbf16>, vector<4x8x8xf32> -> vector<4x8x8xf32>
    "tpu.trace_stop"() : () -> ()
    %cst_11 = arith.constant 0.353553385 : f32
    %30 = vector.broadcast %cst_11 : f32 to vector<4x8x8xf32>
    %31 = arith.mulf %29, %30 : vector<4x8x8xf32>
    %32 = vector.shape_cast %8 : vector<8x8xf32> to vector<1x8x8xf32>
    %33 = vector.broadcast %32 : vector<1x8x8xf32> to vector<4x8x8xf32>
    %34 = arith.addf %31, %33 : vector<4x8x8xf32>
    %cst_12 = arith.constant dense<0xFF800000> : vector<4x8xf32>
    %35 = vector.multi_reduction <maximumf>, %34, %cst_12 [2] : vector<4x8x8xf32> to vector<4x8xf32>
    %36 = vector.shape_cast %35 : vector<4x8xf32> to vector<4x8x1xf32>
    %37 = vector.broadcast %36 : vector<4x8x1xf32> to vector<4x8x8xf32>
    %38 = arith.subf %34, %37 : vector<4x8x8xf32>
    %39 = math.exp %38 : vector<4x8x8xf32>
    %cst_13 = arith.constant dense<0.000000e+00> : vector<4x8xf32>
    %40 = vector.multi_reduction <add>, %39, %cst_13 [2] : vector<4x8x8xf32> to vector<4x8xf32>
    %41 = vector.shape_cast %40 : vector<4x8xf32> to vector<4x8x1xf32>
    %42 = tpu.reciprocal %41 {approx = true} : vector<4x8x1xf32> -> vector<4x8x1xf32>
    %43 = vector.broadcast %42 : vector<4x8x1xf32> to vector<4x8x8xf32>
    %44 = arith.mulf %39, %43 : vector<4x8x8xf32>
    %45 = arith.truncf %44 : vector<4x8x8xf32> to vector<4x8x8xbf16>
    "tpu.trace_start"() <{level = 10 : i32, message = "hqk,hke->hqe"}> : () -> ()
    %cst_14 = arith.constant dense<0.000000e+00> : vector<4x8x8xf32>
    %46 = tpu.matmul %45, %28, %cst_14 {dimension_numbers = #tpu.dot_dimension_numbers<[2], [1], [1], [2], [0, 0, 0, 1, 1, 2], [0], [0]>} : vector<4x8x8xbf16>, vector<4x8x8xbf16>, vector<4x8x8xf32> -> vector<4x8x8xf32>
    "tpu.trace_stop"() : () -> ()
    %47 = tpu.transpose %46, [1, 0, 2] : vector<4x8x8xf32> -> vector<8x4x8xf32>
    %48 = vector.shape_cast %47 : vector<8x4x8xf32> to vector<8x32xf32>
    %49 = arith.truncf %48 : vector<8x32xf32> to vector<8x32xbf16>
    %c0_15 = arith.constant 0 : index
    %c0_16 = arith.constant 0 : index
    %c0_17 = arith.constant 0 : index
    %50 = vector.load %arg6[%c0_15, %c0_16, %c0_17] : memref<1x32x32xbf16, #tpu.memory_space<vmem>>, vector<1x32x32xbf16>
    %51 = vector.shape_cast %50 : vector<1x32x32xbf16> to vector<32x32xbf16>
    %cst_18 = arith.constant dense<0.000000e+00> : vector<8x32xf32>
    %52 = tpu.matmul %49, %51, %cst_18 {dimension_numbers = #tpu.dot_dimension_numbers<[1], [0], [0], [1], [0, 0, 1, 1], [], []>} : vector<8x32xbf16>, vector<32x32xbf16>, vector<8x32xf32> -> vector<8x32xf32>
    %c0_19 = arith.constant 0 : index
    %c0_20 = arith.constant 0 : index
    %c0_21 = arith.constant 0 : index
    %53 = vector.load %arg7[%c0_19, %c0_20, %c0_21] : memref<1x1x32xf32, #tpu.memory_space<vmem>>, vector<1x1x32xf32>
    %54 = vector.shape_cast %53 : vector<1x1x32xf32> to vector<1x32xf32>
    %55 = vector.broadcast %54 : vector<1x32xf32> to vector<8x32xf32>
    %56 = arith.addf %52, %55 : vector<8x32xf32>
    %57 = arith.addf %5, %56 : vector<8x32xf32>
    %c0_22 = arith.constant 0 : index
    %c0_23 = arith.constant 0 : index
    %c0_24 = arith.constant 0 : index
    %58 = vector.load %arg9[%c0_22, %c0_23, %c0_24] : memref<1x1x32xf32, #tpu.memory_space<vmem>>, vector<1x1x32xf32>
    %59 = vector.shape_cast %58 : vector<1x1x32xf32> to vector<1x32xf32>
    %c0_25 = arith.constant 0 : index
    %c0_26 = arith.constant 0 : index
    %c0_27 = arith.constant 0 : index
    %60 = vector.load %arg10[%c0_25, %c0_26, %c0_27] : memref<1x1x32xf32, #tpu.memory_space<vmem>>, vector<1x1x32xf32>
    %61 = vector.shape_cast %60 : vector<1x1x32xf32> to vector<1x32xf32>
    %cst_28 = arith.constant dense<0.000000e+00> : vector<8xf32>
    %62 = vector.multi_reduction <add>, %57, %cst_28 [1] : vector<8x32xf32> to vector<8xf32>
    %63 = vector.shape_cast %62 : vector<8xf32> to vector<8x1xf32>
    %cst_29 = arith.constant 3.200000e+01 : f32
    %64 = vector.broadcast %cst_29 : f32 to vector<8x1xf32>
    %65 = arith.divf %63, %64 : vector<8x1xf32>
    %66 = vector.broadcast %65 : vector<8x1xf32> to vector<8x32xf32>
    %67 = arith.subf %57, %66 : vector<8x32xf32>
    %68 = arith.mulf %67, %67 : vector<8x32xf32>
    %cst_30 = arith.constant dense<0.000000e+00> : vector<8xf32>
    %69 = vector.multi_reduction <add>, %68, %cst_30 [1] : vector<8x32xf32> to vector<8xf32>
    %70 = vector.shape_cast %69 : vector<8xf32> to vector<8x1xf32>
    %cst_31 = arith.constant 3.200000e+01 : f32
    %71 = vector.broadcast %cst_31 : f32 to vector<8x1xf32>
    %72 = arith.divf %70, %71 : vector<8x1xf32>
    %73 = vector.broadcast %65 : vector<8x1xf32> to vector<8x32xf32>
    %74 = arith.subf %57, %73 : vector<8x32xf32>
    %cst_32 = arith.constant 9.99999974E-6 : f32
    %75 = vector.broadcast %cst_32 : f32 to vector<8x1xf32>
    %76 = arith.addf %72, %75 : vector<8x1xf32>
    %77 = math.rsqrt %76 : vector<8x1xf32>
    %78 = vector.broadcast %77 : vector<8x1xf32> to vector<8x32xf32>
    %79 = arith.mulf %74, %78 : vector<8x32xf32>
    %80 = vector.broadcast %59 : vector<1x32xf32> to vector<8x32xf32>
    %81 = arith.mulf %79, %80 : vector<8x32xf32>
    %82 = vector.broadcast %61 : vector<1x32xf32> to vector<8x32xf32>
    %83 = arith.addf %81, %82 : vector<8x32xf32>
    %c0_33 = arith.constant 0 : index
    %c0_34 = arith.constant 0 : index
    %c0_35 = arith.constant 0 : index
    %84 = vector.load %arg8[%c0_33, %c0_34, %c0_35] : memref<1x1x32xf32, #tpu.memory_space<vmem>>, vector<1x1x32xf32>
    %85 = vector.shape_cast %84 : vector<1x1x32xf32> to vector<1x32xf32>
    %86 = vector.broadcast %85 : vector<1x32xf32> to vector<8x32xf32>
    %87 = arith.addf %83, %86 : vector<8x32xf32>
    %c0_36 = arith.constant 0 : index
    %c0_37 = arith.constant 0 : index
    %c0_38 = arith.constant 0 : index
    %88 = vector.load %arg11[%c0_36, %c0_37, %c0_38] : memref<1x1x32xf32, #tpu.memory_space<vmem>>, vector<1x1x32xf32>
    %89 = vector.shape_cast %88 : vector<1x1x32xf32> to vector<1x32xf32>
    %c0_39 = arith.constant 0 : index
    %c0_40 = arith.constant 0 : index
    %c0_41 = arith.constant 0 : index
    %90 = vector.load %arg12[%c0_39, %c0_40, %c0_41] : memref<1x1x32xf32, #tpu.memory_space<vmem>>, vector<1x1x32xf32>
    %91 = vector.shape_cast %90 : vector<1x1x32xf32> to vector<1x32xf32>
    %cst_42 = arith.constant dense<0.000000e+00> : vector<8xf32>
    %92 = vector.multi_reduction <add>, %87, %cst_42 [1] : vector<8x32xf32> to vector<8xf32>
    %93 = vector.shape_cast %92 : vector<8xf32> to vector<8x1xf32>
    %cst_43 = arith.constant 3.200000e+01 : f32
    %94 = vector.broadcast %cst_43 : f32 to vector<8x1xf32>
    %95 = arith.divf %93, %94 : vector<8x1xf32>
    %96 = vector.broadcast %95 : vector<8x1xf32> to vector<8x32xf32>
    %97 = arith.subf %87, %96 : vector<8x32xf32>
    %98 = arith.mulf %97, %97 : vector<8x32xf32>
    %cst_44 = arith.constant dense<0.000000e+00> : vector<8xf32>
    %99 = vector.multi_reduction <add>, %98, %cst_44 [1] : vector<8x32xf32> to vector<8xf32>
    %100 = vector.shape_cast %99 : vector<8xf32> to vector<8x1xf32>
    %cst_45 = arith.constant 3.200000e+01 : f32
    %101 = vector.broadcast %cst_45 : f32 to vector<8x1xf32>
    %102 = arith.divf %100, %101 : vector<8x1xf32>
    %103 = vector.broadcast %95 : vector<8x1xf32> to vector<8x32xf32>
    %104 = arith.subf %87, %103 : vector<8x32xf32>
    %cst_46 = arith.constant 9.99999974E-6 : f32
    %105 = vector.broadcast %cst_46 : f32 to vector<8x1xf32>
    %106 = arith.addf %102, %105 : vector<8x1xf32>
    %107 = math.rsqrt %106 : vector<8x1xf32>
    %108 = vector.broadcast %107 : vector<8x1xf32> to vector<8x32xf32>
    %109 = arith.mulf %104, %108 : vector<8x32xf32>
    %110 = vector.broadcast %89 : vector<1x32xf32> to vector<8x32xf32>
    %111 = arith.mulf %109, %110 : vector<8x32xf32>
    %112 = vector.broadcast %91 : vector<1x32xf32> to vector<8x32xf32>
    %113 = arith.addf %111, %112 : vector<8x32xf32>
    %114 = arith.truncf %113 : vector<8x32xf32> to vector<8x32xbf16>
    %c0_47 = arith.constant 0 : index
    %c0_48 = arith.constant 0 : index
    %c0_49 = arith.constant 0 : index
    %115 = vector.load %arg13[%c0_47, %c0_48, %c0_49] : memref<1x32x64xbf16, #tpu.memory_space<vmem>>, vector<1x32x64xbf16>
    %116 = vector.shape_cast %115 : vector<1x32x64xbf16> to vector<32x64xbf16>
    %cst_50 = arith.constant dense<0.000000e+00> : vector<8x64xf32>
    %117 = tpu.matmul %114, %116, %cst_50 {dimension_numbers = #tpu.dot_dimension_numbers<[1], [0], [0], [1], [0, 0, 1, 1], [], []>} : vector<8x32xbf16>, vector<32x64xbf16>, vector<8x64xf32> -> vector<8x64xf32>
    %c0_51 = arith.constant 0 : index
    %c0_52 = arith.constant 0 : index
    %c0_53 = arith.constant 0 : index
    %118 = vector.load %arg14[%c0_51, %c0_52, %c0_53] : memref<1x1x64xf32, #tpu.memory_space<vmem>>, vector<1x1x64xf32>
    %119 = vector.shape_cast %118 : vector<1x1x64xf32> to vector<1x64xf32>
    %120 = vector.broadcast %119 : vector<1x64xf32> to vector<8x64xf32>
    %121 = arith.addf %117, %120 : vector<8x64xf32>
    %cst_54 = arith.constant 0.000000e+00 : f32
    %122 = vector.broadcast %cst_54 : f32 to vector<8x64xf32>
    %123 = arith.maximumf %121, %122 : vector<8x64xf32>
    %124 = arith.truncf %123 : vector<8x64xf32> to vector<8x64xbf16>
    %c0_55 = arith.constant 0 : index
    %c0_56 = arith.constant 0 : index
    %c0_57 = arith.constant 0 : index
    %125 = vector.load %arg15[%c0_55, %c0_56, %c0_57] : memref<1x64x32xbf16, #tpu.memory_space<vmem>>, vector<1x64x32xbf16>
    %126 = vector.shape_cast %125 : vector<1x64x32xbf16> to vector<64x32xbf16>
    %cst_58 = arith.constant dense<0.000000e+00> : vector<8x32xf32>
    %127 = tpu.matmul %124, %126, %cst_58 {dimension_numbers = #tpu.dot_dimension_numbers<[1], [0], [0], [1], [0, 0, 1, 1], [], []>} : vector<8x64xbf16>, vector<64x32xbf16>, vector<8x32xf32> -> vector<8x32xf32>
    %c0_59 = arith.constant 0 : index
    %c0_60 = arith.constant 0 : index
    %c0_61 = arith.constant 0 : index
    %128 = vector.load %arg16[%c0_59, %c0_60, %c0_61] : memref<1x1x32xf32, #tpu.memory_space<vmem>>, vector<1x1x32xf32>
    %129 = vector.shape_cast %128 : vector<1x1x32xf32> to vector<1x32xf32>
    %130 = vector.broadcast %129 : vector<1x32xf32> to vector<8x32xf32>
    %131 = arith.addf %127, %130 : vector<8x32xf32>
    %132 = arith.addf %113, %131 : vector<8x32xf32>
    %c0_62 = arith.constant 0 : index
    %c0_63 = arith.constant 0 : index
    %c0_64 = arith.constant 0 : index
    %133 = vector.load %arg17[%c0_62, %c0_63, %c0_64] : memref<1x1x32xf32, #tpu.memory_space<vmem>>, vector<1x1x32xf32>
    %134 = vector.shape_cast %133 : vector<1x1x32xf32> to vector<1x32xf32>
    %c0_65 = arith.constant 0 : index
    %c0_66 = arith.constant 0 : index
    %c0_67 = arith.constant 0 : index
    %135 = vector.load %arg18[%c0_65, %c0_66, %c0_67] : memref<1x1x32xf32, #tpu.memory_space<vmem>>, vector<1x1x32xf32>
    %136 = vector.shape_cast %135 : vector<1x1x32xf32> to vector<1x32xf32>
    %cst_68 = arith.constant dense<0.000000e+00> : vector<8xf32>
    %137 = vector.multi_reduction <add>, %132, %cst_68 [1] : vector<8x32xf32> to vector<8xf32>
    %138 = vector.shape_cast %137 : vector<8xf32> to vector<8x1xf32>
    %cst_69 = arith.constant 3.200000e+01 : f32
    %139 = vector.broadcast %cst_69 : f32 to vector<8x1xf32>
    %140 = arith.divf %138, %139 : vector<8x1xf32>
    %141 = vector.broadcast %140 : vector<8x1xf32> to vector<8x32xf32>
    %142 = arith.subf %132, %141 : vector<8x32xf32>
    %143 = arith.mulf %142, %142 : vector<8x32xf32>
    %cst_70 = arith.constant dense<0.000000e+00> : vector<8xf32>
    %144 = vector.multi_reduction <add>, %143, %cst_70 [1] : vector<8x32xf32> to vector<8xf32>
    %145 = vector.shape_cast %144 : vector<8xf32> to vector<8x1xf32>
    %cst_71 = arith.constant 3.200000e+01 : f32
    %146 = vector.broadcast %cst_71 : f32 to vector<8x1xf32>
    %147 = arith.divf %145, %146 : vector<8x1xf32>
    %148 = vector.broadcast %140 : vector<8x1xf32> to vector<8x32xf32>
    %149 = arith.subf %132, %148 : vector<8x32xf32>
    %cst_72 = arith.constant 9.99999974E-6 : f32
    %150 = vector.broadcast %cst_72 : f32 to vector<8x1xf32>
    %151 = arith.addf %147, %150 : vector<8x1xf32>
    %152 = math.rsqrt %151 : vector<8x1xf32>
    %153 = vector.broadcast %152 : vector<8x1xf32> to vector<8x32xf32>
    %154 = arith.mulf %149, %153 : vector<8x32xf32>
    %155 = vector.broadcast %134 : vector<1x32xf32> to vector<8x32xf32>
    %156 = arith.mulf %154, %155 : vector<8x32xf32>
    %157 = vector.broadcast %136 : vector<1x32xf32> to vector<8x32xf32>
    %158 = arith.addf %156, %157 : vector<8x32xf32>
    %159 = arith.index_cast %arg1 : i32 to index
    %c0_73 = arith.constant 0 : index
    %c0_74 = arith.constant 0 : index
    %160 = vector.load %arg19[%159, %c0_73, %c0_74] : memref<2x8x32xf32, #tpu.memory_space<vmem>>, vector<1x8x32xf32>
    %161 = vector.shape_cast %160 : vector<1x8x32xf32> to vector<8x32xf32>
    %162 = vector.shape_cast %158 : vector<8x32xf32> to vector<1x8x32xf32>
    tpu.vector_store %arg19[%159, %c0_73, %c0_74], %162 {strides = array<i32>} : memref<2x8x32xf32, #tpu.memory_space<vmem>>, vector<1x8x32xf32>,
    return
  }
  func.func @transform_0(%arg0: i32, %arg1: i32) -> (i32, i32, i32) {
    %c0_i32 = arith.constant 0 : i32
    %c0_i32_0 = arith.constant 0 : i32
    %c0_i32_1 = arith.constant 0 : i32
    %c0_i32_2 = arith.constant 0 : i32
    return %c0_i32, %c0_i32_0, %c0_i32_1 : i32, i32, i32
  }
  func.func @transform_1(%arg0: i32, %arg1: i32) -> (i32, i32, i32) {
    %c0_i32 = arith.constant 0 : i32
    %c0_i32_0 = arith.constant 0 : i32
    %c0_i32_1 = arith.constant 0 : i32
    %c0_i32_2 = arith.constant 0 : i32
    return %c0_i32, %c0_i32_0, %c0_i32_1 : i32, i32, i32
  }
  func.func @transform_2(%arg0: i32, %arg1: i32) -> (i32, i32, i32) {
    %c0_i32 = arith.constant 0 : i32
    %c0_i32_0 = arith.constant 0 : i32
    %c0_i32_1 = arith.constant 0 : i32
    return %arg0, %c0_i32, %c0_i32_0 : i32, i32, i32
  }
  func.func @transform_3(%arg0: i32, %arg1: i32) -> (i32, i32, i32) {
    %c0_i32 = arith.constant 0 : i32
    %c0_i32_0 = arith.constant 0 : i32
    %c0_i32_1 = arith.constant 0 : i32
    return %arg0, %c0_i32, %c0_i32_0 : i32, i32, i32
  }
  func.func @transform_4(%arg0: i32, %arg1: i32) -> (i32, i32, i32) {
    %c0_i32 = arith.constant 0 : i32
    %c0_i32_0 = arith.constant 0 : i32
    %c0_i32_1 = arith.constant 0 : i32
    return %arg0, %c0_i32, %c0_i32_0 : i32, i32, i32
  }
  func.func @transform_5(%arg0: i32, %arg1: i32) -> (i32, i32, i32) {
    %c0_i32 = arith.constant 0 : i32
    %c0_i32_0 = arith.constant 0 : i32
    %c0_i32_1 = arith.constant 0 : i32
    return %arg0, %c0_i32, %c0_i32_0 : i32, i32, i32
  }
  func.func @transform_6(%arg0: i32, %arg1: i32) -> (i32, i32, i32) {
    %c0_i32 = arith.constant 0 : i32
    %c0_i32_0 = arith.constant 0 : i32
    %c0_i32_1 = arith.constant 0 : i32
    return %arg0, %c0_i32, %c0_i32_0 : i32, i32, i32
  }
  func.func @transform_7(%arg0: i32, %arg1: i32) -> (i32, i32, i32) {
    %c0_i32 = arith.constant 0 : i32
    %c0_i32_0 = arith.constant 0 : i32
    %c0_i32_1 = arith.constant 0 : i32
    return %arg0, %c0_i32, %c0_i32_0 : i32, i32, i32
  }
  func.func @transform_8(%arg0: i32, %arg1: i32) -> (i32, i32, i32) {
    %c0_i32 = arith.constant 0 : i32
    %c0_i32_0 = arith.constant 0 : i32
    %c0_i32_1 = arith.constant 0 : i32
    return %arg0, %c0_i32, %c0_i32_0 : i32, i32, i32
  }
  func.func @transform_9(%arg0: i32, %arg1: i32) -> (i32, i32, i32) {
    %c0_i32 = arith.constant 0 : i32
    %c0_i32_0 = arith.constant 0 : i32
    %c0_i32_1 = arith.constant 0 : i32
    return %arg0, %c0_i32, %c0_i32_0 : i32, i32, i32
  }
  func.func @transform_10(%arg0: i32, %arg1: i32) -> (i32, i32, i32) {
    %c0_i32 = arith.constant 0 : i32
    %c0_i32_0 = arith.constant 0 : i32
    %c0_i32_1 = arith.constant 0 : i32
    return %arg0, %c0_i32, %c0_i32_0 : i32, i32, i32
  }
  func.func @transform_11(%arg0: i32, %arg1: i32) -> (i32, i32, i32) {
    %c0_i32 = arith.constant 0 : i32
    %c0_i32_0 = arith.constant 0 : i32
    %c0_i32_1 = arith.constant 0 : i32
    return %arg0, %c0_i32, %c0_i32_0 : i32, i32, i32
  }
  func.func @transform_12(%arg0: i32, %arg1: i32) -> (i32, i32, i32) {
    %c0_i32 = arith.constant 0 : i32
    %c0_i32_0 = arith.constant 0 : i32
    %c0_i32_1 = arith.constant 0 : i32
    return %arg0, %c0_i32, %c0_i32_0 : i32, i32, i32
  }
  func.func @transform_13(%arg0: i32, %arg1: i32) -> (i32, i32, i32) {
    %c0_i32 = arith.constant 0 : i32
    %c0_i32_0 = arith.constant 0 : i32
    %c0_i32_1 = arith.constant 0 : i32
    return %arg0, %c0_i32, %c0_i32_0 : i32, i32, i32
  }
  func.func @transform_14(%arg0: i32, %arg1: i32) -> (i32, i32, i32) {
    %c0_i32 = arith.constant 0 : i32
    %c0_i32_0 = arith.constant 0 : i32
    %c0_i32_1 = arith.constant 0 : i32
    return %arg0, %c0_i32, %c0_i32_0 : i32, i32, i32
  }
  func.func @transform_15(%arg0: i32, %arg1: i32) -> (i32, i32, i32) {
    %c0_i32 = arith.constant 0 : i32
    %c0_i32_0 = arith.constant 0 : i32
    %c0_i32_1 = arith.constant 0 : i32
    return %arg0, %c0_i32, %c0_i32_0 : i32, i32, i32
  }
  func.func @transform_16(%arg0: i32, %arg1: i32) -> (i32, i32, i32) {
    %c0_i32 = arith.constant 0 : i32
    %c0_i32_0 = arith.constant 0 : i32
    %c0_i32_1 = arith.constant 0 : i32
    return %arg0, %c0_i32, %c0_i32_0 : i32, i32, i32
  }
  func.func @transform_17(%arg0: i32, %arg1: i32) -> (i32, i32, i32) {
    %c0_i32 = arith.constant 0 : i32
    %c0_i32_0 = arith.constant 0 : i32
    %c0_i32_1 = arith.constant 0 : i32
    %c0_i32_2 = arith.constant 0 : i32
    return %c0_i32, %c0_i32_0, %c0_i32_1 : i32, i32, i32
  }
}

</mosaic_0001>

<bundles_post_ra>
// kernel: tpu_custom_call.1
= control target key start
LH: loop header
LB: loop body
LE: loop exit
PB: predicated region body
PF: predicated region fallthrough
CT: control target
= control target key end

     0   :  { %s3464_s0 = inlined_call_operand.hbm [shape: f32[2,8,32], index: 0, kind: input, shape index: {}]   ;;  %s3465_s1 = inlined_call_operand.hbm [shape: f32[2,1,8], index: 1, kind: input, shape index: {}]   ;;  %s3466_s2 = inlined_call_operand.vmem [shape: bf16[2,32,96], index: 2, kind: input, shape index: {}]   ;;  %s3467_s3 = inlined_call_operand.vmem [shape: f32[2,1,96], index: 3, kind: input, shape index: {}]   ;;  %s3468_s4 = inlined_call_operand.vmem [shape: bf16[2,32,32], index: 4, kind: input, shape index: {}]   ;;  %s3469_s5 = inlined_call_operand.vmem [shape: f32[2,1,32], index: 5, kind: input, shape index: {}]   ;;  %s3470_s6 = inlined_call_operand.vmem [shape: f32[2,1,32], index: 6, kind: input, shape index: {}]   ;;  %s3471_s7 = inlined_call_operand.vmem [shape: f32[2,1,32], index: 7, kind: input, shape index: {}]   ;;  %s3472_s8 = inlined_call_operand.vmem [shape: f32[2,1,32], index: 8, kind: input, shape index: {}]   ;;  %s3473_s9 = inlined_call_operand.vmem [shape: f32[2,1,32], index: 9, kind: input, shape index: {}]   ;;  %s3474_s10 = inlined_call_operand.vmem [shape: f32[2,1,32], index: 10, kind: input, shape index: {}]   ;;  %s3475_s11 = inlined_call_operand.vmem [shape: bf16[2,32,64], index: 11, kind: input, shape index: {}]   ;;  %s3476_s12 = inlined_call_operand.vmem [shape: f32[2,1,64], index: 12, kind: input, shape index: {}]   ;;  %s3477_s13 = inlined_call_operand.vmem [shape: bf16[2,64,32], index: 13, kind: input, shape index: {}]   ;;  %s3478_s14 = inlined_call_operand.vmem [shape: f32[2,1,32], index: 14, kind: input, shape index: {}]   ;;  %s3479_s15 = inlined_call_operand.vmem [shape: f32[2,1,32], index: 15, kind: input, shape index: {}]   ;;  %s3480_s16 = inlined_call_operand.vmem [shape: f32[2,1,32], index: 16, kind: input, shape index: {}]   ;;  %s3481_s17 = inlined_call_operand.hbm [shape: f32[2,8,32], index: 17, kind: output, shape index: {}]  }
   0x1   :  { %3491 = sst [smem:[#allocation21_spill]] %s3464_s0 }
   0x2   :  { %3492 = sst [smem:[#allocation22_spill]] %s3465_s1 }
   0x3   :  { %3493 = sst [smem:[#allocation23_spill]] %s3466_s2 }
   0x4   :  { %3494 = sst [smem:[#allocation24_spill]] %s3467_s3 }
   0x5   :  { %3495 = sst [smem:[#allocation25_spill]] %s3468_s4 }
   0x6   :  { %3496 = sst [smem:[#allocation26_spill]] %s3481_s17 }
   0x7   :  { %22 = vsyncpa [#allocation4], 0 }
   0x8   :  { %23 = vsyncpa [#allocation7], 0 }
   0x9   :  { %24 = vsyncpa [#allocation5], 0  ;;  %s3009_s24 = smov 0   ;;  %s3011_s25 = smov 0  }
   0xa   :  { %s3013_s26 = smov 0   ;;  %s3015_s27 = smov 0  }
   0xb   :  { %s3017_s28 = smov 0  }
   0xc LB: > { %3497 = sst [smem:[#allocation12_spill]] %s2881_s24  ;;  %s3482_s29 = sadd.s32 4294967295, %s2897_s28   ;;  %s2897_s28 = sphi %s3017_s28, %s30_s28   ;;  %s2893_s27 = sphi %s3015_s27, %s3534_s27   ;;  %s2889_s26 = sphi %s3013_s26, %s3533_s26   ;;  %s2885_s25 = sphi %s3011_s25, %s3532_s25   ;;  %s2881_s24 = sphi %s3009_s24, %s3531_s24  }
   0xd   : > { %3498 = sst [smem:[#allocation13_spill]] %s2885_s25  ;;  %s39_s0 = sadd.s32 1, %s2889_s26 }
   0xe   : > { %3499 = sst [smem:[#allocation14_spill]] %s2889_s26  ;;  %p40_p0 = scmp.ge.s32.totalorder %s39_s0, 2 }
   0xf   : > { %3500 = sst [smem:[#allocation15_spill]] %s2893_s27  ;;  %s42_s30 = sadd.s32 1, %s2893_s27 }
  0x10   : > { %3501 = sst [smem:[#allocation16_spill]] %s2897_s28  ;;  %p2472_p1 = scmp.ge.s32.totalorder %s2897_s28, 1 }
  0x11   : > { %p500_p2 = scmp.lt.s32.totalorder %s2897_s28, 5  ;;  %s3536_s0 = smov (%p40_p0, %s39_s0), 0 }
  0x12   : > { %3502 = sst [smem:[#allocation17_spill]] %s3536_s0  ;;  %s3538_s30 = smov (!%p40_p0, %s42_s30), %s2893_s27 }
  0x13   : > { %p3042_p3 = pnand %p2472_p1, %p500_p2  ;;  %p44_p4 = scmp.ge.s32.totalorder %s3538_s30, 2 }
  0x14   : > { %p3048_p5 = scmp.eq.s32.totalorder %s3482_s29, 0  ;;  %s2899_s1 = smov [#allocation3]  }
  0x15   : > { %p2666_p6 = pneg %p3042_p3  ;;  %s3540_s30 = smov (%p44_p4, %s3538_s30), 0 }
  0x16   : > { %3505 = sst [smem:[#allocation18_spill]] %s3540_s30  ;;  %s512_s20 = sshll.u32 %s2899_s1, 4  ;;  %s513_s20 = int_to_ptr.vmem [resolvable:$true] %s512_s20 }
  0x17   : > { %p3058_p7 = pnand %p3048_p5, %p2666_p6  ;;  %s2782_s22 = scalar_lea.vmem %s513_s20, 256 }
  0x18   : > { %p2783_p9 = scmp.ne.s32.totalorder %s513_s20, %s2782_s22  ;;  %p2790_p12 = scmp.lt.s32.totalorder %s513_s20, %s513_s20 }
  0x19   : > { %p2773_p8 = pneg %p3058_p7  ;;  %p2791_p13 = scmp.lt.s32.totalorder %s2782_s22, %s2782_s22 }
  0x1b   : > { %p2785_p10 = pnand %p2783_p9, %p2773_p8  ;;  %p2792_p0 = por %p2791_p13, %p2790_p12 }
  0x1d   : > { %p2786_p11 = pneg %p2785_p10 }
  0x1f   : > { %p2793_p1 = pnand %p2792_p0, %p2786_p11 }
  0x21   : > { %2796 = shalt.err (!%p2793_p1)
}
  0x22   : > { %s2900_s23 = smov 128   ;;  %s2901_s1 = smov 8  }
  0x23   : > { %s3507_s0 = sld [smem:[#allocation21_spill]]  ;;  %s2902_s27 = smov [#allocation6]  }
  0x24   : > { %s525_s26 = sshll.u32 %s2902_s27, 4  ;;  %s526_s26 = int_to_ptr.vmem [resolvable:$true] %s525_s26 }
  0x25   : > { %s2808_s17 = scalar_lea.vmem %s526_s26, 32  ;;  %p2816_p9 = scmp.lt.s32.totalorder %s526_s26, %s526_s26 }
  0x26   : > { %p2809_p2 = scmp.ne.s32.totalorder %s526_s26, %s2808_s17  ;;  %p2817_p10 = scmp.lt.s32.totalorder %s2808_s17, %s2808_s17 }
  0x28   : > { %p2811_p4 = pnand %p2809_p2, %p2773_p8  ;;  %p2818_p11 = por %p2817_p10, %p2816_p9 }
  0x29   : > { %2669 = dma.hbm_to_vmem [thread:$0]  (!%p3058_p7), %s3507_s0, 256, %s513_s20, [#allocation4], %s2900_s23, %s2900_s23, %s2901_s1  }
  0x2a   : > { %p2812_p6 = pneg %p2811_p4 }
  0x2c   : > { %p2819_p12 = pnand %p2818_p11, %p2812_p6 }
  0x2e   : > { %2822 = shalt.err (!%p2819_p12)
}
  0x2f   : > { %s2903_s22 = smov 16   ;;  %s2904_s28 = smov 1  }
  0x30   : > { %s3508_s30 = sld [smem:[#allocation22_spill]] }
  0x32   : > { %639 = sbr.rel (%p3042_p3) target bundleno = 2983 (0xba7), region = 88 }
  0x36   : > { %2672 = dma.hbm_to_vmem [thread:$0]  (!%p3058_p7), %s3508_s30, 32, %s526_s26, [#allocation7], %s2903_s22, %s2903_s22, %s2904_s28  }
  0x37   : > { %2868 = dma.done.wait (%p3048_p5), [#allocation4], 256  }
  0x38   : > { %2870 = vsyncadd (%p3048_p5), [#allocation4], 4294967040 }
  0x39   : > { %2872 = dma.done.wait (%p3048_p5), [#allocation7], 32  }
  0x3a   : > { %2874 = vsyncadd (%p3048_p5), [#allocation7], 4294967264  ;;  %p738_p8 = scmp.lt.s32.totalorder %s2885_s25, 1  ;;  %s3510_s2 = sld [smem:[#allocation23_spill]] }
  0x3b   : > { %s3512_s4 = sld [smem:[#allocation25_spill]] }
  0x3c   : > { %s3092_s17 = scalar_select %p738_p8, %s2885_s25, 1 }
  0x3d   : > { %s3514_s25 = sld [smem:[#allocation13_spill]] }
  0x3e   : > { %s2536_s26 = sshll.u32 %s3092_s17, 4  ;;  %s759_s3 = scalar_lea.vmem %s3471_s7, %s3092_s17 }
  0x3f   : > { %s3136_s24 = scalar_lea.vmem %s3475_s11, %s2536_s26  ;;  %s776_s28 = scalar_lea.vmem %s3476_s12, %s3092_s17 }
  0x40   : > { %s3102_s21 = scalar_lea.vmem %s3510_s2, %s2536_s26  ;;  %s2539_s27 = sshll.u32 %s3092_s17, 5 }
  0x41   : > { %3511 = sst [smem:[#allocation19_spill]] %s3102_s21  ;;  %s3107_s22 = scalar_lea.vmem %s3512_s4, %s2536_s26 }
  0x42   : > { %3513 = sst [smem:[#allocation20_spill]] %s3107_s22  ;;  %s784_s2 = scalar_lea.vmem %s3478_s14, %s3092_s17 }
  0x43   : > { %s3150_s1 = scalar_lea.vmem %s3477_s13, %s2539_s27  ;;  %s787_s30 = scalar_lea.vmem %s3479_s15, %s3092_s17 }
  0x44   : > { %s790_s29 = scalar_lea.vmem %s3480_s16, %s3092_s17  ;;  %p2487_p3 = scmp.ne.s32.totalorder %s3514_s25, 0 }
  0x45   : > { %s3515_s18 = sld [smem:[#allocation12_spill]] (!%p2487_p3) }
  0x46   : > { %795 = sbr.rel (%p2487_p3) target bundleno = 82 (0x52), region = 100 }
  0x4b   : > { %v796_v0 = vlaneseq  ;;  %s2489_s19 = sshll.u32 %s3515_s18, 3  ;;  %vm817_vm0 = vcmask 261120   ;;  %s800_s27 = scalar_lea.vmem [#allocation6], %s3515_s18  ;;  %vm812_vm1 = vcmask 64512  }
  0x4c   : > { %v2488_v3 = vld [vmem:[%s800_s27] ss:$0 sm:$0xff]  ;;  %s814_s20 = scalar_lea.vmem [#allocation3], %s2489_s19  ;;  %s816_s21 = scalar_lea.vmem [#allocation8], %s2489_s19 }
  0x4d   : > { %v797_v1 = vshrl.u32 %v796_v0, 7  ;;  %v799_v2 = vand.u32 127, %v796_v0  ;;  %v815_v4 = vld [vmem:[%s814_s20] sm:$0xff]  ;;  %s811_s23 = scalar_lea.vmem [#allocation2], %s2489_s19 }
  0x4e   : > { %818 = vst.msk [vmem:[%s816_s21] sm:$0xff] %vm817_vm0, %v815_v4 }
  0x4f   : > { %vm808_vm2 = vcmp.gt.s32.totalorder %v799_v2, %v797_v1 }
  0x50   : > { %v809_v5 = vsel %vm808_vm2, -1e+30, %v2488_v3 }
  0x51   : > { %813 = vst.msk [vmem:[%s811_s23] sm:$0xff] %vm812_vm1, %v809_v5 }
  0x52 PF: > { %s3516_s4 = sld [smem:[#allocation19_spill]]  ;;  %v2905_v7 = vmov 0.0   ;;  %vm2906_vm3 = vmmov 0   ;;  %vm848_vm4 = vcmask 261120   ;;  %s2907_s20 = smov 104   ;;  %v907_v22 = vlaneseq }
  0x53   : > { %s3517_s22 = sld [smem:[#allocation12_spill]]  ;;  %2570 = vmatprep.subr.bf16.mxu0 %v2905_v7  ;;  %2578 = vmatprep.subr.bf16.mxu1 %v2905_v7  ;;  %s2908_s21 = smov 120   ;;  %v2911_v20 = vmov 1983009808   ;;  %v2912_v25 = vmov 1934713408  }
  0x54   : > { %2574 = vmatprep.mubr.msk.bf16.mxu0 %vm2906_vm3, %v2905_v7  ;;  %2580 = vmatprep.mubr.msk.bf16.mxu1 %vm2906_vm3, %v2905_v7  ;;  %s3518_s19 = sld [smem:[#allocation24_spill]]  ;;  %s2909_s23 = smov 96   ;;  %v905_v21 = vunpack.c.l.s4 %v2911_v20  ;;  %v908_v24 = vshrl.u32 %v907_v22, 7  ;;  %v937_v26 = vunpack.c.l.s4 %v2912_v25  ;;  %vm1346_vm5 = vcmask 64512  }
  0x55   : > { %vm1590_vm6 = vcmask 1043456   ;;  %s2914_s18 = smov 16   ;;  %vm1921_vm7 = vcmask 130048   ;;  %vm1923_vm8 = vcmask 195584   ;;  %vm2168_vm9 = vcmask 523264  }
  0x56   : > { %v906_v23 = vunpack.c.0.s8 %v905_v21  ;;  %v938_v32 = vunpack.c.0.s8 %v937_v26 }
  0x58   : > { %v2739_v6 = vld [vmem:[%s3516_s4 + $0x8] sm:$0xff]   ;;  %v2740_v8 = vld [vmem:[%s3516_s4] sm:$0xff]   ;;  %s2910_s4 = smov 112   ;;  %v3210_v29 = vsub.s32 %v906_v23, %v908_v24  ;;  %v3220_v39 = vsub.s32 %v938_v32, %v908_v24 }
  0x59   : > { %2571 = vmatpush3.bf16.msra.mxu0 %v2739_v6  ;;  %s2490_s26 = sshll.u32 %s3517_s22, 3  ;;  %s2913_s22 = smov 64  }
  0x5a   : > { %2572 = vmatprep.subr.bf16.mxu0 %v2905_v7  ;;  %s3175_s0 = scalar_lea.vmem [#allocation8], %s2490_s26  ;;  %s3519_s27 = scalar_lea.vmem %s3518_s19, %s3092_s17 }
  0x5b   : > { %v3178_v9 = vld [vmem:[%s3175_s0] sm:$0xff]  ;;  %s822_s25 = scalar_lea.vmem [#allocation2], %s2490_s26  ;;  %s3520_s26 = sld [smem:[#allocation20_spill]] }
  0x5c   : > { %v824_v10 = vpack.c.bf16 %v3178_v9, %v3178_v9  ;;  %v2491_v11 = vld [vmem:[%s3519_s27] ss:$0 sm:$0xff]  ;;  %s2915_s19 = smov 8   ;;  %s2916_s27 = smov 24  }
  0x5d   : > { %2573 = vmatpush3.bf16.msra.mxu0 %v2740_v8 }
  0x5e   : > { %2584 = vmatprep.subr.bf16.mxu0 %v2905_v7 }
  0x60   : > { %2575 = vmatmul.mubr.msk.bf16.vlgmr.msra.gmra.mxu0 %vm848_vm4, %v824_v10 }
  0x61   : > { %2586 = vmatprep.mubr.msk.bf16.mxu0 %vm2906_vm3, %v2905_v7 }
 0x120   : > { %v886_v12 = vpop.f32.mrf.mxu0 }
 0x121   : > { %v3191_v13 = vadd.f32 %v2491_v11, %v886_v12 }
 0x122   : > { %v2576_v14 = vpop.f32.mrf.mxu0 }
 0x123   : > { %899 = vrot.lane.b32.xlu1 %v3191_v13, %s2907_s20  ;;  %893 = vrot.lane.b32.xlu0 %v3191_v13, %s2908_s21  ;;  %s3523_s21 = scalar_lea.vmem %s3470_s6, %s3092_s17 }
 0x124   : > { %v889_v15 = vpop.f32.mrf.mxu0 }
 0x126   : > { %v2577_v16 = vpop.f32.mrf.mxu0 }
 0x127   : > { %1042 = vrot.lane.b32.xlu1 %v3191_v13, %s2909_s23  ;;  %896 = vrot.lane.b32.xlu0 %v3191_v13, %s2910_s4 }
 0x195   : > { %v3197_v17 = vpop.permute.xlu0 %893  ;;  %v3200_v18 = vpop.permute.xlu1 %899 }
 0x196   : > { %1044 = vrot.lane.b32.xlu0 %v3197_v17, %s2909_s23  ;;  %v918_v30 = vcombine.low %v3197_v17, %v3200_v18  ;;  %v919_v31 = vcombine.high %v3197_v17, %v3200_v18 }
 0x198   : > { %v926_v35 = vrot.slane %v918_v30, %v3210_v29  ;;  %v933_v36 = vrot.slane %v919_v31, %v3210_v29 }
 0x199   : > { %v3202_v19 = vpop.permute.xlu0 %896  ;;  %v1043_v37 = vpop.permute.xlu1 %1042 }
 0x19a   : > { %1048 = vrot.lane.b32.xlu0 %v3200_v18, %s2909_s23  ;;  %1046 = vrot.lane.b32.xlu1 %v3202_v19, %s2909_s23  ;;  %v902_v27 = vcombine.low %v3191_v13, %v3202_v19  ;;  %v903_v28 = vcombine.high %v3191_v13, %v3202_v19  ;;  %s3521_s23 = scalar_lea.vmem %s3469_s5, %s3092_s17 }
 0x19c   : > { %v910_v33 = vrot.slane %v902_v27, %v3210_v29  ;;  %v917_v34 = vrot.slane %v903_v28, %v3210_v29 }
 0x19e   : > { %v934_v40 = vcombine.low %v910_v33, %v926_v35  ;;  %v935_v41 = vcombine.high %v910_v33, %v926_v35  ;;  %v950_v42 = vcombine.low %v917_v34, %v933_v36  ;;  %v951_v43 = vcombine.high %v917_v34, %v933_v36 }
 0x1a0   : > { %v942_v50 = vrot.slane %v934_v40, %v3220_v39  ;;  %v949_v51 = vrot.slane %v935_v41, %v3220_v39  ;;  %v958_v52 = vrot.slane %v950_v42, %v3220_v39  ;;  %v965_v53 = vrot.slane %v951_v43, %v3220_v39 }
 0x1a2   : > { %v970_v62 = vcombine.low %v942_v50, %v949_v51  ;;  %v2495_v63 = vcombine.high %v942_v50, %v949_v51  ;;  %v986_v0 = vcombine.low %v958_v52, %v965_v53  ;;  %v2496_v1 = vcombine.high %v958_v52, %v965_v53 }
 0x1a4   : > { %v977_v12 = vrot.slane %v970_v62, %v3210_v29  ;;  %v985_v14 = vrot.slane %v2495_v63, %v3210_v29  ;;  %v993_v15 = vrot.slane %v986_v0, %v3210_v29  ;;  %v1001_v16 = vrot.slane %v2496_v1, %v3210_v29  ;;  %v823_v0 = vld [vmem:[%s822_s25] sm:$0xff] }
 0x1a6   : > { %v1002_v31 = vcombine.low %v977_v12, %v985_v14  ;;  %v1018_v32 = vcombine.low %v993_v15, %v1001_v16 }
 0x1a8   : > { %v1010_v40 = vrot.slane %v1002_v31, %v3220_v39  ;;  %v1026_v41 = vrot.slane %v1018_v32, %v3220_v39 }
 0x208   : > { %v1045_v38 = vpop.permute.xlu0 %1044 }
 0x20c   : > { %v1047_v44 = vpop.permute.xlu1 %1046  ;;  %v1049_v45 = vpop.permute.xlu0 %1048 }
 0x20d   : > { %v1054_v46 = vcombine.low %v1043_v37, %v1047_v44  ;;  %v1055_v47 = vcombine.high %v1043_v37, %v1047_v44  ;;  %v1070_v48 = vcombine.low %v1045_v38, %v1049_v45  ;;  %v1071_v49 = vcombine.high %v1045_v38, %v1049_v45 }
 0x20f   : > { %v1062_v54 = vrot.slane %v1054_v46, %v3210_v29  ;;  %v1069_v55 = vrot.slane %v1055_v47, %v3210_v29  ;;  %v1078_v56 = vrot.slane %v1070_v48, %v3210_v29  ;;  %v1085_v57 = vrot.slane %v1071_v49, %v3210_v29 }
 0x210   : > { %v1003_v46 = vcombine.high %v977_v12, %v985_v14  ;;  %v1019_v47 = vcombine.high %v993_v15, %v1001_v16  ;;  %v1034_v48 = vcombine.low %v1010_v40, %v1026_v41  ;;  %v1035_v49 = vcombine.high %v1010_v40, %v1026_v41 }
 0x211   : > { %v1086_v58 = vcombine.low %v1062_v54, %v1078_v56  ;;  %v1087_v59 = vcombine.high %v1062_v54, %v1078_v56  ;;  %v1102_v60 = vcombine.low %v1069_v55, %v1085_v57  ;;  %v1103_v61 = vcombine.high %v1069_v55, %v1085_v57 }
 0x212   : > { %v1038_v52 = vpack.c.bf16 %v1034_v48, %v1034_v48  ;;  %v1039_v53 = vpack.c.bf16 %v1035_v49, %v1035_v49  ;;  %v1017_v54 = vrot.slane %v1003_v46, %v3220_v39  ;;  %v1033_v55 = vrot.slane %v1019_v47, %v3220_v39 }
 0x213   : > { %v1094_v2 = vrot.slane %v1086_v58, %v3220_v39  ;;  %v1101_v3 = vrot.slane %v1087_v59, %v3220_v39  ;;  %v1110_v4 = vrot.slane %v1102_v60, %v3220_v39  ;;  %v1117_v5 = vrot.slane %v1103_v61, %v3220_v39 }
 0x214   : > { %v1036_v58 = vcombine.low %v1017_v54, %v1033_v55  ;;  %v1037_v59 = vcombine.high %v1017_v54, %v1033_v55 }
 0x215   : > { %v1122_v6 = vcombine.low %v1094_v2, %v1101_v3  ;;  %v2497_v8 = vcombine.high %v1094_v2, %v1101_v3  ;;  %v1138_v10 = vcombine.low %v1110_v4, %v1117_v5  ;;  %v2498_v11 = vcombine.high %v1110_v4, %v1117_v5 }
 0x216   : > { %v1040_v60 = vpack.c.bf16 %v1036_v58, %v1036_v58  ;;  %v1041_v61 = vpack.c.bf16 %v1037_v59, %v1037_v59 }
 0x217   : > { %v1129_v20 = vrot.slane %v1122_v6, %v3210_v29  ;;  %v1137_v21 = vrot.slane %v2497_v8, %v3210_v29  ;;  %v1145_v22 = vrot.slane %v1138_v10, %v3210_v29  ;;  %v1153_v23 = vrot.slane %v2498_v11, %v3210_v29 }
 0x219   : > { %v1154_v24 = vcombine.low %v1129_v20, %v1137_v21  ;;  %v1170_v25 = vcombine.low %v1145_v22, %v1153_v23  ;;  %v1155_v26 = vcombine.high %v1129_v20, %v1137_v21  ;;  %v1171_v27 = vcombine.high %v1145_v22, %v1153_v23 }
 0x21b   : > { %v1162_v28 = vrot.slane %v1154_v24, %v3220_v39  ;;  %v1178_v30 = vrot.slane %v1170_v25, %v3220_v39  ;;  %v1169_v35 = vrot.slane %v1155_v26, %v3220_v39  ;;  %v1185_v36 = vrot.slane %v1171_v27, %v3220_v39 }
 0x21d   : > { %v1186_v33 = vcombine.low %v1162_v28, %v1178_v30  ;;  %v1187_v34 = vcombine.high %v1162_v28, %v1178_v30  ;;  %v1188_v44 = vcombine.low %v1169_v35, %v1185_v36  ;;  %v1189_v45 = vcombine.high %v1169_v35, %v1185_v36 }
 0x21f   : > { %v1190_v37 = vpack.c.bf16 %v1186_v33, %v1186_v33  ;;  %v1191_v38 = vpack.c.bf16 %v1187_v34, %v1187_v34  ;;  %v1192_v50 = vpack.c.bf16 %v1188_v44, %v1188_v44  ;;  %v1193_v51 = vpack.c.bf16 %v1189_v45, %v1189_v45 }
 0x221   : > { %v1351_v42 = vsel %vm1346_vm5, %v1190_v37, 0  ;;  %v1397_v43 = vsel %vm1346_vm5, %v1191_v38, 0  ;;  %v1443_v56 = vsel %vm1346_vm5, %v1192_v50, 0  ;;  %v1489_v57 = vsel %vm1346_vm5, %v1193_v51, 0 }
 0x222   : > { %2579 = vmatpush3.bf16.xpose.msra.mxu1 %v1351_v42  ;;  %2585 = vmatpush3.bf16.xpose.msra.mxu0 %v1397_v43 }
 0x223   : > { %2590 = vmatprep.subr.bf16.mxu1 %v2905_v7  ;;  %2596 = vmatprep.subr.bf16.mxu0 %v2905_v7 }
 0x229   : > { %2581 = vmatmul.mubr.msk.bf16.vlgmr.msra.gmra.mxu1 %vm1346_vm5, %v1038_v52  ;;  %2587 = vmatmul.mubr.msk.bf16.vlgmr.msra.gmra.mxu0 %vm1346_vm5, %v1039_v53 }
 0x22a   : > { %2591 = vmatpush3.bf16.xpose.msra.mxu1 %v1443_v56  ;;  %2597 = vmatpush3.bf16.xpose.msra.mxu0 %v1489_v57 }
 0x22b   : > { %2592 = vmatprep.mubr.msk.bf16.mxu1 %vm2906_vm3, %v2905_v7  ;;  %2598 = vmatprep.mubr.msk.bf16.mxu0 %vm2906_vm3, %v2905_v7 }
 0x22c   : > { %2602 = vmatprep.subr.bf16.mxu1 %v2905_v7  ;;  %2608 = vmatprep.subr.bf16.mxu0 %v2905_v7 }
 0x231   : > { %2593 = vmatmul.mubr.msk.bf16.vlgmr.msra.gmra.mxu1 %vm1346_vm5, %v1040_v60  ;;  %2599 = vmatmul.mubr.msk.bf16.vlgmr.msra.gmra.mxu0 %vm1346_vm5, %v1041_v61 }
 0x232   : > { %2604 = vmatprep.mubr.msk.bf16.mxu1 %vm2906_vm3, %v2905_v7  ;;  %2610 = vmatprep.mubr.msk.bf16.mxu0 %vm2906_vm3, %v2905_v7 }
 0x2e9   : > { %v1387_v62 = vpop.f32.mrf.mxu1  ;;  %v1433_v63 = vpop.f32.mrf.mxu0 }
 0x2ea   : > { %v1531_v1 = vmul.f32 0.35355338, %v1387_v62  ;;  %v1532_v2 = vmul.f32 0.35355338, %v1433_v63 }
 0x2eb   : > { %v2582_v3 = vpop.f32.mrf.mxu1  ;;  %v2588_v4 = vpop.f32.mrf.mxu0 }
 0x2ec   : > { %v1535_v5 = vadd.f32 %v1531_v1, %v823_v0  ;;  %v1536_v6 = vadd.f32 %v1532_v2, %v823_v0 }
 0x2ed   : > { %v1390_v8 = vpop.f32.mrf.mxu1  ;;  %v1436_v10 = vpop.f32.mrf.mxu0 }
 0x2ee   : > { %v1539_v11 = vsel %vm1346_vm5, %v1535_v5, -inf  ;;  %v1542_v12 = vsel %vm1346_vm5, %v1536_v6, -inf }
 0x2ef   : > { %1540 = vmax.xlane.f32.xlu1 %v1539_v11  ;;  %v2583_v14 = vpop.f32.mrf.mxu1  ;;  %1543 = vmax.xlane.f32.xlu0 %v1542_v12  ;;  %v2589_v15 = vpop.f32.mrf.mxu0 }
 0x2f1   : > { %v1479_v16 = vpop.f32.mrf.mxu1  ;;  %v1525_v20 = vpop.f32.mrf.mxu0 }
 0x2f2   : > { %v1533_v21 = vmul.f32 0.35355338, %v1479_v16  ;;  %v1534_v22 = vmul.f32 0.35355338, %v1525_v20 }
 0x2f3   : > { %v2594_v23 = vpop.f32.mrf.mxu1  ;;  %v2600_v24 = vpop.f32.mrf.mxu0 }
 0x2f4   : > { %v1537_v25 = vadd.f32 %v1533_v21, %v823_v0  ;;  %v1538_v26 = vadd.f32 %v1534_v22, %v823_v0 }
 0x2f5   : > { %v1482_v27 = vpop.f32.mrf.mxu1  ;;  %v1528_v28 = vpop.f32.mrf.mxu0 }
 0x2f6   : > { %v1545_v30 = vsel %vm1346_vm5, %v1537_v25, -inf  ;;  %v1548_v31 = vsel %vm1346_vm5, %v1538_v26, -inf }
 0x2f7   : > { %v2595_v32 = vpop.f32.mrf.mxu1  ;;  %1546 = vmax.xlane.f32.xlu0 %v1545_v30  ;;  %1549 = vmax.xlane.f32.xlu1 %v1548_v31  ;;  %v2601_v33 = vpop.f32.mrf.mxu0 }
 0x308   : > { %1196 = vrot.lane.b32.xlu1 %v3197_v17, %s2913_s22 }
 0x30d   : > { %1194 = vrot.lane.b32.xlu0 %v3191_v13, %s2913_s22 }
 0x378   : > { %v1541_v34 = vpop.xlane.xlu1 %1540  ;;  %v1544_v35 = vpop.xlane.xlu0 %1543 }
 0x379   : > { %v1551_v36 = vsub.f32 %v1535_v5, %v1541_v34  ;;  %v1552_v37 = vsub.f32 %v1536_v6, %v1544_v35 }
 0x37b   : > { %v1555_v38 = vmul.f32 1.442695, %v1551_v36  ;;  %v1557_v40 = vmul.f32 1.442695, %v1552_v37 }
 0x37d   : > { %2749 = vpow2.f32 %v1555_v38 }
 0x37e   : > { %2751 = vpow2.f32 %v1557_v40 }
 0x380   : > { %v1550_v13 = vpop.xlane.xlu1 %1549  ;;  %v1547_v44 = vpop.xlane.xlu0 %1546 }
 0x381   : > { %v1554_v45 = vsub.f32 %v1538_v26, %v1550_v13  ;;  %v1553_v46 = vsub.f32 %v1537_v25, %v1547_v44 }
 0x383   : > { %v1561_v47 = vmul.f32 1.442695, %v1554_v45  ;;  %v1559_v48 = vmul.f32 1.442695, %v1553_v46 }
 0x384   : > { %v1197_v52 = vpop.permute.xlu1 %1196 }
 0x385   : > { %2753 = vpow2.f32 %v1561_v47 }
 0x386   : > { %2755 = vpow2.f32 %v1559_v48 }
 0x38a   : > { %v3278_v41 = vpop.eup %2749 }
 0x38b   : > { %v3280_v42 = vpop.eup %2751  ;;  %v1563_v43 = vsel %vm1346_vm5, %v3278_v41, 0.0 }
 0x38c   : > { %1564 = vadd.xlane.f32.xlu0 %v1563_v43  ;;  %v1566_v17 = vsel %vm1346_vm5, %v3280_v42, 0.0 }
 0x38d   : > { %1567 = vadd.xlane.f32.xlu1 %v1566_v17 }
 0x392   : > { %v3288_v49 = vpop.eup %2753 }
 0x393   : > { %v3290_v50 = vpop.eup %2755  ;;  %v1572_v51 = vsel %vm1346_vm5, %v3288_v49, 0.0 }
 0x39e   : > { %1198 = vrot.lane.b32.xlu1 %v3202_v19, %s2913_s22  ;;  %v1569_v19 = vsel %vm1346_vm5, %v3290_v50, 0.0 }
 0x3a2   : > { %1200 = vrot.lane.b32.xlu0 %v3200_v18, %s2913_s22  ;;  %v1195_v18 = vpop.permute.xlu0 %1194  ;;  %s3525_s22 = scalar_lea.vmem %s3474_s10, %s3092_s17 }
 0x3c1   : > { %1573 = vadd.xlane.f32.xlu0 %v1572_v51 }
 0x3c2   : > { %1570 = vadd.xlane.f32.xlu1 %v1569_v19 }
 0x415   : > { %v1565_v53 = vpop.xlane.xlu0 %1564 }
 0x416   : > { %v1568_v54 = vpop.xlane.xlu1 %1567  ;;  %2757 = vrcp.f32 %v1565_v53 }
 0x417   : > { %2759 = vrcp.f32 %v1568_v54 }
 0x419   : > { %v1201_v55 = vpop.permute.xlu0 %1200 }
 0x41a   : > { %v1222_v56 = vcombine.low %v1197_v52, %v1201_v55  ;;  %v1223_v57 = vcombine.high %v1197_v52, %v1201_v55  ;;  %v1199_v58 = vpop.permute.xlu1 %1198 }
 0x41b   : > { %v1206_v59 = vcombine.low %v1195_v18, %v1199_v58  ;;  %v1207_v60 = vcombine.high %v1195_v18, %v1199_v58 }
 0x41c   : > { %v1230_v61 = vrot.slane %v1222_v56, %v3210_v29  ;;  %v1237_v62 = vrot.slane %v1223_v57, %v3210_v29 }
 0x41d   : > { %v1214_v63 = vrot.slane %v1206_v59, %v3210_v29  ;;  %v1221_v0 = vrot.slane %v1207_v60, %v3210_v29 }
 0x41f   : > { %v1238_v1 = vcombine.low %v1214_v63, %v1230_v61  ;;  %v1239_v2 = vcombine.high %v1214_v63, %v1230_v61  ;;  %v1254_v3 = vcombine.low %v1221_v0, %v1237_v62  ;;  %v1255_v4 = vcombine.high %v1221_v0, %v1237_v62 }
 0x421   : > { %v1246_v5 = vrot.slane %v1238_v1, %v3220_v39  ;;  %v1253_v6 = vrot.slane %v1239_v2, %v3220_v39  ;;  %v1262_v8 = vrot.slane %v1254_v3, %v3220_v39  ;;  %v1269_v10 = vrot.slane %v1255_v4, %v3220_v39 }
 0x423   : > { %v1274_v11 = vcombine.low %v1246_v5, %v1253_v6  ;;  %v2499_v12 = vcombine.high %v1246_v5, %v1253_v6  ;;  %v1290_v14 = vcombine.low %v1262_v8, %v1269_v10  ;;  %v2500_v15 = vcombine.high %v1262_v8, %v1269_v10  ;;  %v2758_v27 = vpop.eup %2757 }
 0x424   : > { %v2760_v33 = vpop.eup %2759  ;;  %v1579_v43 = vmul.f32 %v2758_v27, %v3278_v41 }
 0x425   : > { %v1281_v16 = vrot.slane %v1274_v11, %v3210_v29  ;;  %v1289_v20 = vrot.slane %v2499_v12, %v3210_v29  ;;  %v1297_v21 = vrot.slane %v1290_v14, %v3210_v29  ;;  %v1305_v22 = vrot.slane %v2500_v15, %v3210_v29 }
 0x426   : > { %v1580_v17 = vmul.f32 %v2760_v33, %v3280_v42  ;;  %v1583_v47 = vpack.c.bf16 %v1579_v43, %v1579_v43 }
 0x427   : > { %v1306_v23 = vcombine.low %v1281_v16, %v1289_v20  ;;  %v1322_v24 = vcombine.low %v1297_v21, %v1305_v22  ;;  %v1307_v25 = vcombine.high %v1281_v16, %v1289_v20  ;;  %v1323_v26 = vcombine.high %v1297_v21, %v1305_v22 }
 0x428   : > { %v1584_v48 = vpack.c.bf16 %v1580_v17, %v1580_v17 }
 0x429   : > { %v1314_v28 = vrot.slane %v1306_v23, %v3220_v39  ;;  %v1330_v30 = vrot.slane %v1322_v24, %v3220_v39  ;;  %v1321_v31 = vrot.slane %v1307_v25, %v3220_v39  ;;  %v1337_v32 = vrot.slane %v1323_v26, %v3220_v39  ;;  %v2741_v24 = vld [vmem:[%s3520_s26 + $0x8] sm:$0xff]  }
 0x42b   : > { %v1338_v34 = vcombine.low %v1314_v28, %v1330_v30  ;;  %v1339_v35 = vcombine.high %v1314_v28, %v1330_v30  ;;  %v1340_v36 = vcombine.low %v1321_v31, %v1337_v32  ;;  %v1341_v37 = vcombine.high %v1321_v31, %v1337_v32 }
 0x42d   : > { %v1342_v38 = vpack.c.bf16 %v1338_v34, %v1338_v34  ;;  %v1343_v40 = vpack.c.bf16 %v1339_v35, %v1339_v35  ;;  %v1344_v45 = vpack.c.bf16 %v1340_v36, %v1340_v36  ;;  %v1345_v46 = vpack.c.bf16 %v1341_v37, %v1341_v37  ;;  %v2742_v35 = vld [vmem:[%s3520_s26] sm:$0xff]  }
 0x42f   : > { %v1592_v13 = vsel %vm1590_vm6, %v1342_v38, 0  ;;  %v1638_v44 = vsel %vm1590_vm6, %v1343_v40, 0  ;;  %v1684_v41 = vsel %vm1590_vm6, %v1344_v45, 0  ;;  %v1730_v42 = vsel %vm1590_vm6, %v1345_v46, 0 }
 0x430   : > { %2603 = vmatpush3.bf16.msra.mxu1 %v1592_v13  ;;  %2609 = vmatpush3.bf16.msra.mxu0 %v1638_v44 }
 0x431   : > { %2614 = vmatprep.subr.bf16.mxu1 %v2905_v7  ;;  %2620 = vmatprep.subr.bf16.mxu0 %v2905_v7 }
 0x433   : > { %2605 = vmatmul.mubr.msk.bf16.vlgmr.msra.gmra.mxu1 %vm1346_vm5, %v1583_v47  ;;  %2611 = vmatmul.mubr.msk.bf16.vlgmr.msra.gmra.mxu0 %vm1346_vm5, %v1584_v48 }
 0x434   : > { %2615 = vmatpush3.bf16.msra.mxu1 %v1684_v41  ;;  %2621 = vmatpush3.bf16.msra.mxu0 %v1730_v42 }
 0x435   : > { %2616 = vmatprep.mubr.msk.bf16.mxu1 %vm2906_vm3, %v2905_v7  ;;  %2622 = vmatprep.mubr.msk.bf16.mxu0 %vm2906_vm3, %v2905_v7 }
 0x436   : > { %2626 = vmatprep.subr.bf16.mxu1 %v2905_v7  ;;  %2634 = vmatprep.subr.bf16.mxu0 %v2905_v7 }
 0x44a   : > { %v1574_v51 = vpop.xlane.xlu0 %1573 }
 0x44b   : > { %2761 = vrcp.f32 %v1574_v51  ;;  %v1571_v19 = vpop.xlane.xlu1 %1570 }
 0x44c   : > { %2763 = vrcp.f32 %v1571_v19 }
 0x458   : > { %v2762_v18 = vpop.eup %2761 }
 0x459   : > { %v2764_v52 = vpop.eup %2763  ;;  %v1582_v53 = vmul.f32 %v2762_v18, %v3288_v49 }
 0x45a   : > { %v1581_v54 = vmul.f32 %v2764_v52, %v3290_v50 }
 0x45b   : > { %v1586_v55 = vpack.c.bf16 %v1582_v53, %v1582_v53 }
 0x45c   : > { %v1585_v56 = vpack.c.bf16 %v1581_v54, %v1581_v54 }
 0x45d   : > { %2623 = vmatmul.mubr.msk.bf16.vlgmr.msra.gmra.mxu0 %vm1346_vm5, %v1586_v55 }
 0x45e   : > { %2617 = vmatmul.mubr.msk.bf16.vlgmr.msra.gmra.mxu1 %vm1346_vm5, %v1585_v56  ;;  %2638 = vmatprep.mubr.msk.bf16.mxu0 %vm2906_vm3, %v2905_v7  ;;  %v2511_v56 = vld [vmem:[%s3521_s23] ss:$0 sm:$0xff]  ;;  %s3524_s23 = scalar_lea.vmem %s3473_s9, %s3092_s17 }
 0x45f   : > { %2630 = vmatprep.mubr.msk.bf16.mxu1 %vm2906_vm3, %v2905_v7  ;;  %2627 = vmatpush3.bf16.msra.mxu1 %v2741_v24 }
 0x460   : > { %2628 = vmatprep.subr.bf16.mxu1 %v2905_v7 }
 0x463   : > { %2629 = vmatpush3.bf16.msra.mxu1 %v2742_v35 }
 0x464   : > { %2642 = vmatprep.subr.bf16.mxu1 %v2905_v7 }
 0x4f3   : > { %v1628_v57 = vpop.f32.mrf.mxu1  ;;  %v1674_v58 = vpop.f32.mrf.mxu0 }
 0x4f5   : > { %v2606_v59 = vpop.f32.mrf.mxu1  ;;  %v2612_v60 = vpop.f32.mrf.mxu0 }
 0x4f7   : > { %v1631_v61 = vpop.f32.mrf.mxu1  ;;  %v1677_v49 = vpop.f32.mrf.mxu0 }
 0x4f9   : > { %v2607_v62 = vpop.f32.mrf.mxu1  ;;  %v2613_v50 = vpop.f32.mrf.mxu0 }
 0x51d   : > { %v1766_v63 = vpop.f32.mrf.mxu0 }
 0x51e   : > { %v1720_v0 = vpop.f32.mrf.mxu1  ;;  %v1788_v1 = vcombine.low %v1674_v58, %v1766_v63  ;;  %v1789_v2 = vcombine.high %v1674_v58, %v1766_v63 }
 0x51f   : > { %v1772_v3 = vcombine.low %v1628_v57, %v1720_v0  ;;  %v1773_v4 = vcombine.high %v1628_v57, %v1720_v0  ;;  %v2624_v5 = vpop.f32.mrf.mxu0 }
 0x520   : > { %v1796_v6 = vrot.slane %v1788_v1, %v3210_v29  ;;  %v1803_v8 = vrot.slane %v1789_v2, %v3210_v29  ;;  %v2618_v10 = vpop.f32.mrf.mxu1 }
 0x521   : > { %v1780_v11 = vrot.slane %v1772_v3, %v3210_v29  ;;  %v1787_v12 = vrot.slane %v1773_v4, %v3210_v29  ;;  %v1769_v14 = vpop.f32.mrf.mxu0 }
 0x522   : > { %v1723_v15 = vpop.f32.mrf.mxu1 }
 0x523   : > { %v1804_v16 = vcombine.low %v1780_v11, %v1796_v6  ;;  %v1805_v20 = vcombine.high %v1780_v11, %v1796_v6  ;;  %v1820_v21 = vcombine.low %v1787_v12, %v1803_v8  ;;  %v1821_v22 = vcombine.high %v1787_v12, %v1803_v8  ;;  %v2625_v23 = vpop.f32.mrf.mxu0  ;;  %v2515_v6 = vld [vmem:[%s759_s3] ss:$0 sm:$0xff] }
 0x524   : > { %v2619_v25 = vpop.f32.mrf.mxu1  ;;  %v2517_v12 = vld [vmem:[%s3523_s21] ss:$0 sm:$0xff] }
 0x525   : > { %v1812_v26 = vrot.slane %v1804_v16, %v3220_v39  ;;  %v1819_v27 = vrot.slane %v1805_v20, %v3220_v39  ;;  %v1828_v28 = vrot.slane %v1820_v21, %v3220_v39  ;;  %v1835_v30 = vrot.slane %v1821_v22, %v3220_v39  ;;  %v2743_v25 = vld [vmem:[%s3136_s24 + $0x8] sm:$0xff]  }
 0x526   : > { %2635 = vmatpush3.bf16.msra.mxu0 %v2743_v25 }
 0x527   : > { %v1840_v31 = vcombine.low %v1812_v26, %v1819_v27  ;;  %v2509_v32 = vcombine.high %v1812_v26, %v1819_v27  ;;  %v1856_v33 = vcombine.low %v1828_v28, %v1835_v30  ;;  %v2510_v34 = vcombine.high %v1828_v28, %v1835_v30  ;;  %v2744_v26 = vld [vmem:[%s3136_s24] sm:$0xff]   ;;  %2636 = vmatprep.subr.bf16.mxu0 %v2905_v7  ;;  %v2745_v27 = vld [vmem:[%s3150_s1 + $0x18] sm:$0xff]   ;;  %v2746_v28 = vld [vmem:[%s3150_s1 + $0x10] sm:$0xff]   ;;  %s2917_s24 = smov [#allocation8]  }
 0x529   : > { %v1847_v36 = vrot.slane %v1840_v31, %v3210_v29  ;;  %v1855_v37 = vrot.slane %v2509_v32, %v3210_v29  ;;  %v1863_v38 = vrot.slane %v1856_v33, %v3210_v29  ;;  %v1871_v40 = vrot.slane %v2510_v34, %v3210_v29  ;;  %v2518_v34 = vld [vmem:[%s3524_s23] ss:$0 sm:$0xff]  ;;  %s2249_s23 = sshll.u32 %s2917_s24, 4  ;;  %s2250_s23 = int_to_ptr.vmem [resolvable:$true] %s2249_s23 }
 0x52a   : > { %2637 = vmatpush3.bf16.msra.mxu0 %v2744_v26  ;;  %p2830_p1 = scmp.lt.s32.totalorder %s2250_s23, %s2250_s23 }
 0x52b   : > { %v1873_v43 = vcombine.high %v1847_v36, %v1855_v37  ;;  %v1889_v17 = vcombine.high %v1863_v38, %v1871_v40  ;;  %v1872_v13 = vcombine.low %v1847_v36, %v1855_v37  ;;  %v1888_v44 = vcombine.low %v1863_v38, %v1871_v40  ;;  %v2519_v36 = vld [vmem:[%s3525_s22] ss:$0 sm:$0xff] }
 0x52d   : > { %v1887_v45 = vrot.slane %v1873_v43, %v3220_v39  ;;  %v1903_v46 = vrot.slane %v1889_v17, %v3220_v39  ;;  %v1880_v47 = vrot.slane %v1872_v13, %v3220_v39  ;;  %v1896_v48 = vrot.slane %v1888_v44, %v3220_v39  ;;  %v2747_v43 = vld [vmem:[%s3150_s1 + $0x8] sm:$0xff]   ;;  %v2748_v17 = vld [vmem:[%s3150_s1] sm:$0xff]   ;;  %s3526_s1 = sld [smem:[#allocation16_spill]] }
 0x52e   : > { %v2520_v13 = vld [vmem:[%s776_s28] ss:$0 sm:$0xff] }
 0x52f   : > { %v1906_v41 = vcombine.low %v1887_v45, %v1903_v46  ;;  %v1905_v42 = vcombine.high %v1880_v47, %v1896_v48  ;;  %v1904_v51 = vcombine.low %v1880_v47, %v1896_v48  ;;  %v1907_v29 = vcombine.high %v1887_v45, %v1903_v46 }
 0x531   : > { %1913 = vrot.lane.b32.xlu1 %v1906_v41, %s2914_s18  ;;  %1909 = vrot.lane.b32.xlu0 %v1905_v42, %s2915_s19  ;;  %s3522_s18 = scalar_lea.vmem %s3472_s8, %s3092_s17 }
 0x532   : > { %v2516_v10 = vld [vmem:[%s3522_s18] ss:$0 sm:$0xff] }
 0x533   : > { %s3527_s4 = sadd.s32 4294967295, %s3526_s1  }
 0x534   : > { %p3431_p5 = scmp.eq.s32.totalorder %s3527_s4, 3 }
 0x535   : > { %1917 = vrot.lane.b32.xlu1 %v1907_v29, %s2916_s27 }
 0x5a3   : > { %v1914_v19 = vpop.permute.xlu1 %1913  ;;  %v1910_v18 = vpop.permute.xlu0 %1909 }
 0x5a4   : > { %v1920_v52 = vsel %vm1346_vm5, %v1904_v51, %v1910_v18 }
 0x5a5   : > { %v1922_v39 = vsel %vm1921_vm7, %v1920_v52, %v1914_v19 }
 0x5a7   : > { %v1918_v53 = vpop.permute.xlu1 %1917 }
 0x5a8   : > { %v1924_v54 = vsel %vm1923_vm8, %v1922_v39, %v1918_v53 }
 0x5a9   : > { %v1925_v55 = vpack.c.bf16 %v1924_v54, %v1924_v54 }
 0x5ab   : > { %2631 = vmatmul.mubr.msk.bf16.vlgmr.msra.gmra.mxu1 %vm848_vm4, %v1925_v55 }
 0x5ac   : > { %2650 = vmatprep.mubr.msk.bf16.mxu1 %vm2906_vm3, %v2905_v7  ;;  %2643 = vmatpush3.bf16.msra.mxu1 %v2745_v27 }
 0x5ad   : > { %2644 = vmatprep.subr.bf16.mxu1 %v2905_v7 }
 0x5b0   : > { %2645 = vmatpush3.bf16.msra.mxu1 %v2746_v28 }
 0x5b1   : > { %2646 = vmatprep.subr.bf16.mxu1 %v2905_v7 }
 0x5b4   : > { %2647 = vmatpush3.bf16.msra.mxu1 %v2747_v43 }
 0x5b5   : > { %2648 = vmatprep.subr.bf16.mxu1 %v2905_v7  ;;  %v2524_v7 = vld [vmem:[%s784_s2] ss:$0 sm:$0xff] }
 0x5b8   : > { %2649 = vmatpush3.bf16.msra.mxu1 %v2748_v17 }
 0x66b   : > { %v1986_v57 = vpop.f32.mrf.mxu1 }
 0x66c   : > { %v1987_v58 = vadd.f32 %v2511_v56, %v1986_v57 }
 0x66d   : > { %v2632_v59 = vpop.f32.mrf.mxu1 }
 0x66e   : > { %v1992_v60 = vadd.f32 %v1987_v58, %v3178_v9 }
 0x66f   : > { %v1989_v61 = vpop.f32.mrf.mxu1 }
 0x670   : > { %v1995_v49 = vsel %vm848_vm4, %v1992_v60, 0.0 }
 0x671   : > { %1996 = vadd.xlane.f32.xlu0 %v1995_v49  ;;  %v2633_v62 = vpop.f32.mrf.mxu1 }
 0x672   : > { %v2530_v62 = vld [vmem:[%s787_s30] ss:$0 sm:$0xff]  ;;  %s2823_s30 = scalar_lea.vmem %s2250_s23, 256 }
 0x673   : > { %p2824_p7 = scmp.ne.s32.totalorder %s2250_s23, %s2823_s30  ;;  %p2831_p2 = scmp.lt.s32.totalorder %s2823_s30, %s2823_s30 }
 0x675   : > { %p2825_p13 = pnand %p2824_p7, %p3431_p5  ;;  %p2832_p4 = por %p2831_p2, %p2830_p1 }
 0x677   : > { %p2826_p0 = pneg %p2825_p13 }
 0x679   : > { %p2833_p6 = pnand %p2832_p4, %p2826_p0 }
 0x6fa   : > { %v1997_v50 = vpop.xlane.xlu0 %1996 }
 0x6fb   : > { %v1999_v63 = vmul.f32 0.03125, %v1997_v50 }
 0x6fd   : > { %v2000_v0 = vsub.f32 %v1992_v60, %v1999_v63  ;;  %v2531_v63 = vld [vmem:[%s790_s29] ss:$0 sm:$0xff] }
 0x6ff   : > { %v2001_v1 = vmul.f32 %v2000_v0, %v2000_v0 }
 0x701   : > { %v2002_v2 = vsel %vm848_vm4, %v2001_v1, 0.0 }
 0x702   : > { %2003 = vadd.xlane.f32.xlu1 %v2002_v2 }
 0x78b   : > { %v2004_v3 = vpop.xlane.xlu1 %2003 }
 0x78c   : > { %v2005_v4 = vmul.f32 0.03125, %v2004_v3 }
 0x78e   : > { %v2006_v5 = vadd.f32 1e-05, %v2005_v4 }
 0x790   : > { %2765 = vrsqrt.f32 %v2006_v5 }
 0x79d   : > { %v2766_v9 = vpop.eup %2765 }
 0x79e   : > { %v2008_v8 = vmul.f32 %v2766_v9, %v2000_v0 }
 0x7a0   : > { %v2015_v11 = vmul.f32 %v2515_v6, %v2008_v8 }
 0x7a2   : > { %v2022_v14 = vadd.f32 %v2516_v10, %v2015_v11 }
 0x7a4   : > { %v2030_v15 = vadd.f32 %v2517_v12, %v2022_v14 }
 0x7a6   : > { %v2033_v16 = vsel %vm848_vm4, %v2030_v15, 0.0 }
 0x7a7   : > { %2034 = vadd.xlane.f32.xlu0 %v2033_v16 }
 0x830   : > { %v2035_v20 = vpop.xlane.xlu0 %2034 }
 0x831   : > { %v2036_v21 = vmul.f32 0.03125, %v2035_v20 }
 0x833   : > { %v2037_v22 = vsub.f32 %v2030_v15, %v2036_v21 }
 0x835   : > { %v2038_v23 = vmul.f32 %v2037_v22, %v2037_v22 }
 0x837   : > { %v2039_v24 = vsel %vm848_vm4, %v2038_v23, 0.0 }
 0x838   : > { %2040 = vadd.xlane.f32.xlu0 %v2039_v24 }
 0x8c1   : > { %v2041_v30 = vpop.xlane.xlu0 %2040 }
 0x8c2   : > { %v2042_v31 = vmul.f32 0.03125, %v2041_v30 }
 0x8c4   : > { %v2043_v32 = vadd.f32 1e-05, %v2042_v31 }
 0x8c6   : > { %2767 = vrsqrt.f32 %v2043_v32 }
 0x8d3   : > { %v2768_v33 = vpop.eup %2767 }
 0x8d4   : > { %v2045_v35 = vmul.f32 %v2768_v33, %v2037_v22 }
 0x8d6   : > { %v2052_v37 = vmul.f32 %v2518_v34, %v2045_v35 }
 0x8d8   : > { %v2059_v38 = vadd.f32 %v2519_v36, %v2052_v37 }
 0x8da   : > { %v2060_v40 = vpack.c.bf16 %v2059_v38, %v2059_v38 }
 0x8dc   : > { %2639 = vmatmul.mubr.msk.bf16.vlgmr.msra.gmra.mxu0 %vm848_vm4, %v2060_v40 }
 0x99c   : > { %v2121_v44 = vpop.f32.mrf.mxu0 }
 0x99d   : > { %v2122_v45 = vadd.f32 %v2520_v13, %v2121_v44 }
 0x99e   : > { %v2640_v46 = vpop.f32.mrf.mxu0 }
 0x99f   : > { %v2127_v47 = vmax.f32 %v2122_v45, 0.0 }
 0x9a0   : > { %v2124_v48 = vpop.f32.mrf.mxu0 }
 0x9a1   : > { %v2128_v41 = vpack.c.bf16 %v2127_v47, %v2127_v47 }
 0x9a2   : > { %v2641_v42 = vpop.f32.mrf.mxu0 }
 0x9a3   : > { %2651 = vmatmul.mubr.msk.bf16.vlgmr.msra.gmra.mxu1 %vm2168_vm9, %v2128_v41 }
 0xa63   : > { %v2206_v51 = vpop.f32.mrf.mxu1 }
 0xa64   : > { %v2207_v29 = vadd.f32 %v2524_v7, %v2206_v51 }
 0xa65   : > { %v2652_v19 = vpop.f32.mrf.mxu1 }
 0xa66   : > { %v2212_v18 = vadd.f32 %v2207_v29, %v2059_v38 }
 0xa67   : > { %v2209_v52 = vpop.f32.mrf.mxu1 }
 0xa68   : > { %v2215_v53 = vsel %vm848_vm4, %v2212_v18, 0.0 }
 0xa69   : > { %2216 = vadd.xlane.f32.xlu1 %v2215_v53  ;;  %v2653_v39 = vpop.f32.mrf.mxu1 }
 0xaf2   : > { %v2217_v54 = vpop.xlane.xlu1 %2216 }
 0xaf3   : > { %v2218_v55 = vmul.f32 0.03125, %v2217_v54 }
 0xaf5   : > { %v2219_v56 = vsub.f32 %v2212_v18, %v2218_v55 }
 0xaf7   : > { %v2220_v57 = vmul.f32 %v2219_v56, %v2219_v56 }
 0xaf9   : > { %v2221_v58 = vsel %vm848_vm4, %v2220_v57, 0.0 }
 0xafa   : > { %2222 = vadd.xlane.f32.xlu0 %v2221_v58 }
 0xb83   : > { %v2223_v59 = vpop.xlane.xlu0 %2222 }
 0xb84   : > { %v2224_v60 = vmul.f32 0.03125, %v2223_v59 }
 0xb86   : > { %v2225_v61 = vadd.f32 1e-05, %v2224_v60 }
 0xb88   : > { %2769 = vrsqrt.f32 %v2225_v61 }
 0xb95   : > { %v2770_v49 = vpop.eup %2769 }
 0xb96   : > { %v2227_v50 = vmul.f32 %v2770_v49, %v2219_v56 }
 0xb98   : > { %v2234_v0 = vmul.f32 %v2530_v62, %v2227_v50 }
 0xb9a   : > { %v2241_v1 = vadd.f32 %v2531_v63, %v2234_v0 }
 0xb9c   : > { %2242 = vst.msk [vmem:[%s3175_s0] sm:$0xff] %vm848_vm4, %v2241_v1 }
 0xb9d   : > { %2836 = shalt.err (!%p2833_p6)
}
 0xb9e   : > { %s2918_s17 = smov 128   ;;  %s3529_s26 = sld [smem:[#allocation26_spill]] }
 0xba4   : > { %2663 = dma.vmem_to_hbm [thread:$0]  (%p3431_p5), %s2250_s23, 256, %s3529_s26, [#allocation5], %s2918_s17, %s2918_s17, %s2915_s19  }
 0xba5   : > { %2876 = dma.done.wait (%p3431_p5), [#allocation5], 256  }
 0xba6   : > { %2878 = vsyncadd (%p3431_p5), [#allocation5], 4294967040 }
 0xba7 PF: > { %s3530_s0 = sld [smem:[#allocation16_spill]] }
 0xba8   : > { %s3531_s24 = sld [smem:[#allocation14_spill]] }
 0xba9   : > { %s3532_s25 = sld [smem:[#allocation15_spill]] }
 0xbaa   : > { %s3533_s26 = sld [smem:[#allocation17_spill]] }
 0xbab   : > { %s3534_s27 = sld [smem:[#allocation18_spill]] }
 0xbad   : > { %s30_s28 = sadd.s32 1, %s3530_s0  }
 0xbae   : > { %p27_p9 = scmp.ge.s32.totalorder %s30_s28, 6  }
 0xbb0   :  { %29 = sbr.rel (!%p27_p9) target bundleno = 12 (0xc), region = 176 }
 0xbb5   :  { %2265 = vsyncpa [#allocation4], 1 }
 0xbb6   :  { %2267 = vsyncpa [#allocation4 + $0x1], 1 }
 0xbb7   :  { %2268 = vsyncpa [#allocation7], 1 }
 0xbb8   :  { %2269 = vsyncpa [#allocation5], 1 }
 0xbb9   :  { %2271 = vsyncpa [#allocation5 + $0x1], 1 }

</bundles_post_ra>
